<compile_context>
chip_gen: v7x
topology: tpu7x:2x2x1
jax: 0.10.0
libtpu: 0.0.40
codegen_flags: <defaults>
</compile_context>

<pallas_src>
import functools

import jax
import jax.numpy as jnp
from jax import lax
from jax.experimental import pallas as pl
from jax.experimental.pallas import tpu as pltpu

NODE_TYPES = ('H', 'C', 'Others')
# Same relation ordering as the PyTorch module: src outer loop, dst inner loop.
RELATIONS = [(s, d) for s in NODE_TYPES for d in NODE_TYPES]  # r = s*3 + d

_VMEM = pl.BlockSpec(memory_space=pltpu.MemorySpace.VMEM)


# ---------------------------------------------------------------------------
# Fused Pallas kernel: encoders -> L x HeteroConv(GraphConv) -> heads
# ---------------------------------------------------------------------------
def _fused_forward_kernel(
    # node features, zero-padded to (n_pad, d_in_t)
    xh_ref, xc_ref, xo_ref,
    # per-type MLP encoder params (w1, b1, w2, b2) x {H, C, Others}
    ew1h_ref, eb1h_ref, ew2h_ref, eb2h_ref,
    ew1c_ref, eb1c_ref, ew2c_ref, eb2c_ref,
    ew1o_ref, eb1o_ref, ew2o_ref, eb2o_ref,
    # graph / GNN params
    a_ref,          # (9, n_pad, n_pad) bf16 adjacency A[dst, src], r = s*3 + d
    wrel_ref,       # (L*9, D, D)  GraphConv lin_rel weights
    brelsum_ref,    # (L*3, 1, D)  sum_s brel[s*3+d]  (per dst type)
    wrootsum_ref,   # (L*3, D, D)  sum_s wroot[s*3+d] (per dst type)
    headw_ref,      # (2, D, 1)    prediction heads for H, C
    headb_ref,      # (2, 1, 1)
    # outputs
    outh_ref, outc_ref,     # (n_pad, 1) each
    # scratch
    xs,                     # VMEM (3, n_pad, D) f32, resident across layers
    *, num_valid,           # static (nH, nC, nO)
):
    n_pad = xs.shape[1]
    num_layers = wrel_ref.shape[0] // 9

    # row-validity masks (zero out padded rows)
    row = lax.broadcasted_iota(jnp.int32, (n_pad, 1), 0)
    masks = [row < n for n in num_valid]

    def encode(x, w1, b1, w2, b2):
        # Linear -> ReLU -> (Dropout=id) -> Linear -> ReLU -> (Dropout=id)
        h = jnp.maximum(jnp.dot(x, w1, preferred_element_type=jnp.float32) + b1, 0.0)
        return jnp.maximum(jnp.dot(h, w2, preferred_element_type=jnp.float32) + b2, 0.0)

    enc_in = [
        (xh_ref, ew1h_ref, eb1h_ref, ew2h_ref, eb2h_ref),
        (xc_ref, ew1c_ref, eb1c_ref, ew2c_ref, eb2c_ref),
        (xo_ref, ew1o_ref, eb1o_ref, ew2o_ref, eb2o_ref),
    ]
    for t, (xr, w1r, b1r, w2r, b2r) in enumerate(enc_in):
        e = encode(xr[...], w1r[...], b1r[...], w2r[...], b2r[...])
        xs[t] = jnp.where(masks[t], e, 0.0)

    # HeteroConv(GraphConv, aggr='sum') layers, statically unrolled.
    for l in range(num_layers):
        x_cur = [xs[0], xs[1], xs[2]]        # load current embeddings as values
        new = []
        for d in range(3):
            # root term fused over source types: x_d @ (sum_s Wroot) + sum_s brel
            acc = jnp.dot(x_cur[d], wrootsum_ref[l * 3 + d],
                          preferred_element_type=jnp.float32) + brelsum_ref[l * 3 + d]
            for s in range(3):
                r = s * 3 + d
                # transform-then-aggregate: A[dst,src] @ (x_s @ Wrel_r)
                t_sd = jnp.dot(x_cur[s], wrel_ref[l * 9 + r],
                               preferred_element_type=jnp.float32)
                acc = acc + jnp.dot(a_ref[r], t_sd.astype(jnp.bfloat16),
                                    preferred_element_type=jnp.float32)
            # ReLU (gnn dropout = identity); keep padded rows at exactly zero
            new.append(jnp.where(masks[d], jnp.maximum(acc, 0.0), 0.0))
        for d in range(3):
            xs[d] = new[d]

    # prediction heads fused into the f32 epilogue ('Others' has no head)
    outh_ref[...] = (jnp.dot(xs[0], headw_ref[0], preferred_element_type=jnp.float32)
                     + headb_ref[0]).astype(outh_ref.dtype)
    outc_ref[...] = (jnp.dot(xs[1], headw_ref[1], preferred_element_type=jnp.float32)
                     + headb_ref[1]).astype(outc_ref.dtype)


# ---------------------------------------------------------------------------
# Parameter initialization (deterministic, in-script)
# ---------------------------------------------------------------------------
def _lin_params(key, d_in, d_out, scale=0.1):
    kw, kb = jax.random.split(key)
    w = jax.random.normal(kw, (d_in, d_out), jnp.float32) * scale
    b = jax.random.normal(kb, (1, d_out), jnp.float32) * scale
    return w, b


def init_params(key, in_dim_dict, hidden_dim, out_dim, num_gnn_layers=2):
    params = {'enc': {}, 'layers': [], 'head': {}}
    keys = jax.random.split(key, 8)

    # MLP encoders, one per node type
    for i, nt in enumerate(NODE_TYPES):
        k1, k2 = jax.random.split(keys[i])
        w1, b1 = _lin_params(k1, in_dim_dict[nt], hidden_dim)
        w2, b2 = _lin_params(k2, hidden_dim, out_dim)
        params['enc'][nt] = dict(w1=w1, b1=b1, w2=w2, b2=b2)

    # HeteroConv(GraphConv) layers: 9 relations per layer
    for layer_idx in range(num_gnn_layers):
        k = jax.random.fold_in(keys[3], layer_idx)
        ks = jax.random.split(k, 9)
        wrel, brel, wroot = [], [], []
        for r in range(9):
            ka, kb = jax.random.split(ks[r])
            w_r, b_r = _lin_params(ka, out_dim, out_dim)
            w_root = jax.random.normal(kb, (out_dim, out_dim), jnp.float32) * 0.1
            wrel.append(w_r)
            brel.append(b_r)
            wroot.append(w_root)
        params['layers'].append(dict(
            wrel=jnp.stack(wrel),            # (9, D, D)
            brel=jnp.stack(brel),            # (9, 1, D)
            wroot=jnp.stack(wroot),          # (9, D, D)
        ))

    # Prediction heads for 'H' and 'C'
    for i, nt in enumerate(('H', 'C')):
        w, b = _lin_params(jax.random.fold_in(keys[4], i), out_dim, 1)
        params['head'][nt] = dict(w=w, b=b)
    return params


# ---------------------------------------------------------------------------
# Forward pass: lightweight prep in JAX, one fused Pallas kernel
# ---------------------------------------------------------------------------
def _build_adj(edge_index, n_pad):
    # edge_index: (2, E) int32, row0 = src node ids, row1 = dst node ids.
    src, dst = edge_index[0], edge_index[1]
    a = jnp.zeros((n_pad, n_pad), jnp.float32)
    return a.at[dst, src].add(1.0)   # A[dst, src] = multiplicity of edge


def hetero_gnn_forward(params, x_dict, edge_index_dict, num_nodes):
    d_model = params['layers'][0]['wrel'].shape[-1]
    n_max = max(num_nodes.values())
    n_pad = ((n_max + 7) // 8) * 8          # sublane-align the node axis

    # pad node features to n_pad rows (pad rows are zeroed in-kernel)
    x_pad = {nt: jnp.pad(x_dict[nt], ((0, n_pad - x_dict[nt].shape[0]), (0, 0)))
             for nt in NODE_TYPES}

    # dense adjacency per relation, bf16 (edge counts are small ints -> exact)
    a_stack = jnp.stack([
        _build_adj(edge_index_dict[(s, 'bond', d)], n_pad) for (s, d) in RELATIONS
    ]).astype(jnp.bfloat16)

    # Stack per-layer GraphConv params; pre-sum root weight / rel bias over the
    # source type (HeteroConv aggr='sum' distributes over the root/bias terms).
    wrel_all = jnp.stack([lyr['wrel'] for lyr in params['layers']])     # (L,9,D,D)
    brel_all = jnp.stack([lyr['brel'] for lyr in params['layers']])     # (L,9,1,D)
    wroot_all = jnp.stack([lyr['wroot'] for lyr in params['layers']])   # (L,9,D,D)
    num_layers = wrel_all.shape[0]
    brel_sum = brel_all.reshape(num_layers, 3, 3, 1, d_model).sum(axis=1)
    wroot_sum = wroot_all.reshape(num_layers, 3, 3, d_model, d_model).sum(axis=1)
    wrel_flat = wrel_all.reshape(num_layers * 9, d_model, d_model)
    brel_sum = brel_sum.reshape(num_layers * 3, 1, d_model)
    wroot_sum = wroot_sum.reshape(num_layers * 3, d_model, d_model)

    head_w = jnp.stack([params['head']['H']['w'], params['head']['C']['w']])  # (2,D,1)
    head_b = jnp.stack([params['head']['H']['b'], params['head']['C']['b']])  # (2,1,1)

    enc = params['enc']
    kernel = functools.partial(
        _fused_forward_kernel,
        num_valid=(num_nodes['H'], num_nodes['C'], num_nodes['Others']),
    )

    out_h_pad, out_c_pad = pl.pallas_call(
        kernel,
        out_shape=(jax.ShapeDtypeStruct((n_pad, 1), jnp.float32),
                   jax.ShapeDtypeStruct((n_pad, 1), jnp.float32)),
        in_specs=[_VMEM] * 21,
        out_specs=(_VMEM, _VMEM),
        scratch_shapes=[pltpu.VMEM((3, n_pad, d_model), jnp.float32)],
        # TODO(synk): for large N, add a tiled grid over dst-node blocks
        # (parallel) x src-node blocks (arbitrary) and raise this limit.
        compiler_params=pltpu.CompilerParams(vmem_limit_bytes=32 * 1024 * 1024),
    )(
        x_pad['H'], x_pad['C'], x_pad['Others'],
        enc['H']['w1'], enc['H']['b1'], enc['H']['w2'], enc['H']['b2'],
        enc['C']['w1'], enc['C']['b1'], enc['C']['w2'], enc['C']['b2'],
        enc['Others']['w1'], enc['Others']['b1'], enc['Others']['w2'], enc['Others']['b2'],
        a_stack, wrel_flat, brel_sum, wroot_sum, head_w, head_b,
    )

    return {'H': out_h_pad[:num_nodes['H']],
            'C': out_c_pad[:num_nodes['C']],
            'Others': None}


# ---------------------------------------------------------------------------
if __name__ == "__main__":
    key = jax.random.PRNGKey(0)
    k_feat, k_edge, k_param = jax.random.split(key, 3)

    in_dim_dict = {'H': 5, 'C': 7, 'Others': 6}
    hidden_dim, out_dim = 32, 16
    num_nodes = {'H': 8, 'C': 6, 'Others': 5}
    num_edges = 12

    # node features
    x_dict = {}
    for i, nt in enumerate(NODE_TYPES):
        x_dict[nt] = jax.random.normal(jax.random.fold_in(k_feat, i),
                                       (num_nodes[nt], in_dim_dict[nt]), jnp.float32)

    # edge indices per relation: (2, E) with row0=src ids, row1=dst ids
    edge_index_dict = {}
    for i, (s, d) in enumerate(RELATIONS):
        ks, kd = jax.random.split(jax.random.fold_in(k_edge, i))
        src = jax.random.randint(ks, (num_edges,), 0, num_nodes[s], jnp.int32)
        dst = jax.random.randint(kd, (num_edges,), 0, num_nodes[d], jnp.int32)
        edge_index_dict[(s, 'bond', d)] = jnp.stack([src, dst])

    params = init_params(k_param, in_dim_dict, hidden_dim, out_dim, num_gnn_layers=2)

    out = hetero_gnn_forward(params, x_dict, edge_index_dict, num_nodes)

    jax.block_until_ready(out['H'])
    jax.block_until_ready(out['C'])
    assert out['H'].shape == (num_nodes['H'], 1)
    assert out['C'].shape == (num_nodes['C'], 1)
    assert out['Others'] is None
    print("KERNEL_OK")
</pallas_src>

<mosaic_0001>
module attributes {stable_mosaic.version = 11 : i64} {
  func.func @_fused_forward_kernel(%arg0: memref<8x5xf32, #tpu.memory_space<vmem>>, %arg1: memref<8x7xf32, #tpu.memory_space<vmem>>, %arg2: memref<8x6xf32, #tpu.memory_space<vmem>>, %arg3: memref<5x32xf32, #tpu.memory_space<vmem>>, %arg4: memref<1x32xf32, #tpu.memory_space<vmem>>, %arg5: memref<32x16xf32, #tpu.memory_space<vmem>>, %arg6: memref<1x16xf32, #tpu.memory_space<vmem>>, %arg7: memref<7x32xf32, #tpu.memory_space<vmem>>, %arg8: memref<1x32xf32, #tpu.memory_space<vmem>>, %arg9: memref<32x16xf32, #tpu.memory_space<vmem>>, %arg10: memref<1x16xf32, #tpu.memory_space<vmem>>, %arg11: memref<6x32xf32, #tpu.memory_space<vmem>>, %arg12: memref<1x32xf32, #tpu.memory_space<vmem>>, %arg13: memref<32x16xf32, #tpu.memory_space<vmem>>, %arg14: memref<1x16xf32, #tpu.memory_space<vmem>>, %arg15: memref<9x8x8xbf16, #tpu.memory_space<vmem>>, %arg16: memref<18x16x16xf32, #tpu.memory_space<vmem>>, %arg17: memref<6x1x16xf32, #tpu.memory_space<vmem>>, %arg18: memref<6x16x16xf32, #tpu.memory_space<vmem>>, %arg19: memref<2x16x1xf32, #tpu.memory_space<vmem>>, %arg20: memref<2x1x1xf32, #tpu.memory_space<vmem>>, %arg21: memref<8x1xf32, #tpu.memory_space<vmem>>, %arg22: memref<8x1xf32, #tpu.memory_space<vmem>>, %arg23: memref<3x8x16xf32, #tpu.memory_space<vmem>>) attributes {dimension_semantics = [], scalar_prefetch = 0 : i64, scratch_operands = 1 : i64, tpu.core_type = #tpu.core_type<tc>} {
    %0 = tpu.iota {dimensions = array<i32: 0>} : vector<8x1xi32>
    %c8_i32 = arith.constant 8 : i32
    %1 = vector.broadcast %c8_i32 : i32 to vector<8x1xi32>
    %2 = arith.cmpi slt, %0, %1 : vector<8x1xi32>
    %c6_i32 = arith.constant 6 : i32
    %3 = vector.broadcast %c6_i32 : i32 to vector<8x1xi32>
    %4 = arith.cmpi slt, %0, %3 : vector<8x1xi32>
    %c5_i32 = arith.constant 5 : i32
    %5 = vector.broadcast %c5_i32 : i32 to vector<8x1xi32>
    %6 = arith.cmpi slt, %0, %5 : vector<8x1xi32>
    %c0 = arith.constant 0 : index
    %c0_0 = arith.constant 0 : index
    %7 = vector.load %arg0[%c0, %c0_0] : memref<8x5xf32, #tpu.memory_space<vmem>>, vector<8x5xf32>
    %c0_1 = arith.constant 0 : index
    %c0_2 = arith.constant 0 : index
    %8 = vector.load %arg3[%c0_1, %c0_2] : memref<5x32xf32, #tpu.memory_space<vmem>>, vector<5x32xf32>
    %c0_3 = arith.constant 0 : index
    %c0_4 = arith.constant 0 : index
    %9 = vector.load %arg4[%c0_3, %c0_4] : memref<1x32xf32, #tpu.memory_space<vmem>>, vector<1x32xf32>
    %c0_5 = arith.constant 0 : index
    %c0_6 = arith.constant 0 : index
    %10 = vector.load %arg5[%c0_5, %c0_6] : memref<32x16xf32, #tpu.memory_space<vmem>>, vector<32x16xf32>
    %c0_7 = arith.constant 0 : index
    %c0_8 = arith.constant 0 : index
    %11 = vector.load %arg6[%c0_7, %c0_8] : memref<1x16xf32, #tpu.memory_space<vmem>>, vector<1x16xf32>
    %cst = arith.constant dense<0.000000e+00> : vector<8x32xf32>
    %12 = tpu.matmul %7, %8, %cst {dimension_numbers = #tpu.dot_dimension_numbers<[1], [0], [0], [1], [0, 0, 1, 1], [], []>} : vector<8x5xf32>, vector<5x32xf32>, vector<8x32xf32> -> vector<8x32xf32>
    %13 = vector.broadcast %9 : vector<1x32xf32> to vector<8x32xf32>
    %14 = arith.addf %12, %13 : vector<8x32xf32>
    %cst_9 = arith.constant 0.000000e+00 : f32
    %15 = vector.broadcast %cst_9 : f32 to vector<8x32xf32>
    %16 = arith.maximumf %14, %15 : vector<8x32xf32>
    %cst_10 = arith.constant dense<0.000000e+00> : vector<8x16xf32>
    %17 = tpu.matmul %16, %10, %cst_10 {dimension_numbers = #tpu.dot_dimension_numbers<[1], [0], [0], [1], [0, 0, 1, 1], [], []>} : vector<8x32xf32>, vector<32x16xf32>, vector<8x16xf32> -> vector<8x16xf32>
    %18 = vector.broadcast %11 : vector<1x16xf32> to vector<8x16xf32>
    %19 = arith.addf %17, %18 : vector<8x16xf32>
    %cst_11 = arith.constant 0.000000e+00 : f32
    %20 = vector.broadcast %cst_11 : f32 to vector<8x16xf32>
    %21 = arith.maximumf %19, %20 : vector<8x16xf32>
    %cst_12 = arith.constant 0.000000e+00 : f32
    %22 = vector.shape_cast %2 : vector<8x1xi1> to vector<8x1xi1>
    %23 = vector.broadcast %22 : vector<8x1xi1> to vector<8x16xi1>
    %24 = vector.broadcast %cst_12 : f32 to vector<8x16xf32>
    %25 = arith.select %23, %21, %24 : vector<8x16xi1>, vector<8x16xf32>
    %c0_13 = arith.constant 0 : index
    %c0_14 = arith.constant 0 : index
    %c0_15 = arith.constant 0 : index
    %26 = vector.load %arg23[%c0_13, %c0_14, %c0_15] : memref<3x8x16xf32, #tpu.memory_space<vmem>>, vector<1x8x16xf32>
    %27 = vector.shape_cast %26 : vector<1x8x16xf32> to vector<8x16xf32>
    %28 = vector.shape_cast %25 : vector<8x16xf32> to vector<1x8x16xf32>
    tpu.vector_store %arg23[%c0_13, %c0_14, %c0_15], %28 {strides = array<i32>} : memref<3x8x16xf32, #tpu.memory_space<vmem>>, vector<1x8x16xf32>,
    %c0_16 = arith.constant 0 : index
    %c0_17 = arith.constant 0 : index
    %29 = vector.load %arg1[%c0_16, %c0_17] : memref<8x7xf32, #tpu.memory_space<vmem>>, vector<8x7xf32>
    %c0_18 = arith.constant 0 : index
    %c0_19 = arith.constant 0 : index
    %30 = vector.load %arg7[%c0_18, %c0_19] : memref<7x32xf32, #tpu.memory_space<vmem>>, vector<7x32xf32>
    %c0_20 = arith.constant 0 : index
    %c0_21 = arith.constant 0 : index
    %31 = vector.load %arg8[%c0_20, %c0_21] : memref<1x32xf32, #tpu.memory_space<vmem>>, vector<1x32xf32>
    %c0_22 = arith.constant 0 : index
    %c0_23 = arith.constant 0 : index
    %32 = vector.load %arg9[%c0_22, %c0_23] : memref<32x16xf32, #tpu.memory_space<vmem>>, vector<32x16xf32>
    %c0_24 = arith.constant 0 : index
    %c0_25 = arith.constant 0 : index
    %33 = vector.load %arg10[%c0_24, %c0_25] : memref<1x16xf32, #tpu.memory_space<vmem>>, vector<1x16xf32>
    %cst_26 = arith.constant dense<0.000000e+00> : vector<8x32xf32>
    %34 = tpu.matmul %29, %30, %cst_26 {dimension_numbers = #tpu.dot_dimension_numbers<[1], [0], [0], [1], [0, 0, 1, 1], [], []>} : vector<8x7xf32>, vector<7x32xf32>, vector<8x32xf32> -> vector<8x32xf32>
    %35 = vector.broadcast %31 : vector<1x32xf32> to vector<8x32xf32>
    %36 = arith.addf %34, %35 : vector<8x32xf32>
    %cst_27 = arith.constant 0.000000e+00 : f32
    %37 = vector.broadcast %cst_27 : f32 to vector<8x32xf32>
    %38 = arith.maximumf %36, %37 : vector<8x32xf32>
    %cst_28 = arith.constant dense<0.000000e+00> : vector<8x16xf32>
    %39 = tpu.matmul %38, %32, %cst_28 {dimension_numbers = #tpu.dot_dimension_numbers<[1], [0], [0], [1], [0, 0, 1, 1], [], []>} : vector<8x32xf32>, vector<32x16xf32>, vector<8x16xf32> -> vector<8x16xf32>
    %40 = vector.broadcast %33 : vector<1x16xf32> to vector<8x16xf32>
    %41 = arith.addf %39, %40 : vector<8x16xf32>
    %cst_29 = arith.constant 0.000000e+00 : f32
    %42 = vector.broadcast %cst_29 : f32 to vector<8x16xf32>
    %43 = arith.maximumf %41, %42 : vector<8x16xf32>
    %cst_30 = arith.constant 0.000000e+00 : f32
    %44 = vector.shape_cast %4 : vector<8x1xi1> to vector<8x1xi1>
    %45 = vector.broadcast %44 : vector<8x1xi1> to vector<8x16xi1>
    %46 = vector.broadcast %cst_30 : f32 to vector<8x16xf32>
    %47 = arith.select %45, %43, %46 : vector<8x16xi1>, vector<8x16xf32>
    %c1 = arith.constant 1 : index
    %c0_31 = arith.constant 0 : index
    %c0_32 = arith.constant 0 : index
    %48 = vector.load %arg23[%c1, %c0_31, %c0_32] : memref<3x8x16xf32, #tpu.memory_space<vmem>>, vector<1x8x16xf32>
    %49 = vector.shape_cast %48 : vector<1x8x16xf32> to vector<8x16xf32>
    %50 = vector.shape_cast %47 : vector<8x16xf32> to vector<1x8x16xf32>
    tpu.vector_store %arg23[%c1, %c0_31, %c0_32], %50 {strides = array<i32>} : memref<3x8x16xf32, #tpu.memory_space<vmem>>, vector<1x8x16xf32>,
    %c0_33 = arith.constant 0 : index
    %c0_34 = arith.constant 0 : index
    %51 = vector.load %arg2[%c0_33, %c0_34] : memref<8x6xf32, #tpu.memory_space<vmem>>, vector<8x6xf32>
    %c0_35 = arith.constant 0 : index
    %c0_36 = arith.constant 0 : index
    %52 = vector.load %arg11[%c0_35, %c0_36] : memref<6x32xf32, #tpu.memory_space<vmem>>, vector<6x32xf32>
    %c0_37 = arith.constant 0 : index
    %c0_38 = arith.constant 0 : index
    %53 = vector.load %arg12[%c0_37, %c0_38] : memref<1x32xf32, #tpu.memory_space<vmem>>, vector<1x32xf32>
    %c0_39 = arith.constant 0 : index
    %c0_40 = arith.constant 0 : index
    %54 = vector.load %arg13[%c0_39, %c0_40] : memref<32x16xf32, #tpu.memory_space<vmem>>, vector<32x16xf32>
    %c0_41 = arith.constant 0 : index
    %c0_42 = arith.constant 0 : index
    %55 = vector.load %arg14[%c0_41, %c0_42] : memref<1x16xf32, #tpu.memory_space<vmem>>, vector<1x16xf32>
    %cst_43 = arith.constant dense<0.000000e+00> : vector<8x32xf32>
    %56 = tpu.matmul %51, %52, %cst_43 {dimension_numbers = #tpu.dot_dimension_numbers<[1], [0], [0], [1], [0, 0, 1, 1], [], []>} : vector<8x6xf32>, vector<6x32xf32>, vector<8x32xf32> -> vector<8x32xf32>
    %57 = vector.broadcast %53 : vector<1x32xf32> to vector<8x32xf32>
    %58 = arith.addf %56, %57 : vector<8x32xf32>
    %cst_44 = arith.constant 0.000000e+00 : f32
    %59 = vector.broadcast %cst_44 : f32 to vector<8x32xf32>
    %60 = arith.maximumf %58, %59 : vector<8x32xf32>
    %cst_45 = arith.constant dense<0.000000e+00> : vector<8x16xf32>
    %61 = tpu.matmul %60, %54, %cst_45 {dimension_numbers = #tpu.dot_dimension_numbers<[1], [0], [0], [1], [0, 0, 1, 1], [], []>} : vector<8x32xf32>, vector<32x16xf32>, vector<8x16xf32> -> vector<8x16xf32>
    %62 = vector.broadcast %55 : vector<1x16xf32> to vector<8x16xf32>
    %63 = arith.addf %61, %62 : vector<8x16xf32>
    %cst_46 = arith.constant 0.000000e+00 : f32
    %64 = vector.broadcast %cst_46 : f32 to vector<8x16xf32>
    %65 = arith.maximumf %63, %64 : vector<8x16xf32>
    %cst_47 = arith.constant 0.000000e+00 : f32
    %66 = vector.shape_cast %6 : vector<8x1xi1> to vector<8x1xi1>
    %67 = vector.broadcast %66 : vector<8x1xi1> to vector<8x16xi1>
    %68 = vector.broadcast %cst_47 : f32 to vector<8x16xf32>
    %69 = arith.select %67, %65, %68 : vector<8x16xi1>, vector<8x16xf32>
    %c2 = arith.constant 2 : index
    %c0_48 = arith.constant 0 : index
    %c0_49 = arith.constant 0 : index
    %70 = vector.load %arg23[%c2, %c0_48, %c0_49] : memref<3x8x16xf32, #tpu.memory_space<vmem>>, vector<1x8x16xf32>
    %71 = vector.shape_cast %70 : vector<1x8x16xf32> to vector<8x16xf32>
    %72 = vector.shape_cast %69 : vector<8x16xf32> to vector<1x8x16xf32>
    tpu.vector_store %arg23[%c2, %c0_48, %c0_49], %72 {strides = array<i32>} : memref<3x8x16xf32, #tpu.memory_space<vmem>>, vector<1x8x16xf32>,
    %c0_50 = arith.constant 0 : index
    %c0_51 = arith.constant 0 : index
    %c0_52 = arith.constant 0 : index
    %73 = vector.load %arg23[%c0_50, %c0_51, %c0_52] : memref<3x8x16xf32, #tpu.memory_space<vmem>>, vector<1x8x16xf32>
    %74 = vector.shape_cast %73 : vector<1x8x16xf32> to vector<8x16xf32>
    %c1_53 = arith.constant 1 : index
    %c0_54 = arith.constant 0 : index
    %c0_55 = arith.constant 0 : index
    %75 = vector.load %arg23[%c1_53, %c0_54, %c0_55] : memref<3x8x16xf32, #tpu.memory_space<vmem>>, vector<1x8x16xf32>
    %76 = vector.shape_cast %75 : vector<1x8x16xf32> to vector<8x16xf32>
    %c2_56 = arith.constant 2 : index
    %c0_57 = arith.constant 0 : index
    %c0_58 = arith.constant 0 : index
    %77 = vector.load %arg23[%c2_56, %c0_57, %c0_58] : memref<3x8x16xf32, #tpu.memory_space<vmem>>, vector<1x8x16xf32>
    %78 = vector.shape_cast %77 : vector<1x8x16xf32> to vector<8x16xf32>
    %c0_59 = arith.constant 0 : index
    %c0_60 = arith.constant 0 : index
    %c0_61 = arith.constant 0 : index
    %79 = vector.load %arg18[%c0_59, %c0_60, %c0_61] : memref<6x16x16xf32, #tpu.memory_space<vmem>>, vector<1x16x16xf32>
    %80 = vector.shape_cast %79 : vector<1x16x16xf32> to vector<16x16xf32>
    %cst_62 = arith.constant dense<0.000000e+00> : vector<8x16xf32>
    %81 = tpu.matmul %74, %80, %cst_62 {dimension_numbers = #tpu.dot_dimension_numbers<[1], [0], [0], [1], [0, 0, 1, 1], [], []>} : vector<8x16xf32>, vector<16x16xf32>, vector<8x16xf32> -> vector<8x16xf32>
    %c0_63 = arith.constant 0 : index
    %c0_64 = arith.constant 0 : index
    %c0_65 = arith.constant 0 : index
    %82 = vector.load %arg17[%c0_63, %c0_64, %c0_65] : memref<6x1x16xf32, #tpu.memory_space<vmem>>, vector<1x1x16xf32>
    %83 = vector.shape_cast %82 : vector<1x1x16xf32> to vector<1x16xf32>
    %84 = vector.broadcast %83 : vector<1x16xf32> to vector<8x16xf32>
    %85 = arith.addf %81, %84 : vector<8x16xf32>
    %c0_66 = arith.constant 0 : index
    %c0_67 = arith.constant 0 : index
    %c0_68 = arith.constant 0 : index
    %86 = vector.load %arg16[%c0_66, %c0_67, %c0_68] : memref<18x16x16xf32, #tpu.memory_space<vmem>>, vector<1x16x16xf32>
    %87 = vector.shape_cast %86 : vector<1x16x16xf32> to vector<16x16xf32>
    %cst_69 = arith.constant dense<0.000000e+00> : vector<8x16xf32>
    %88 = tpu.matmul %74, %87, %cst_69 {dimension_numbers = #tpu.dot_dimension_numbers<[1], [0], [0], [1], [0, 0, 1, 1], [], []>} : vector<8x16xf32>, vector<16x16xf32>, vector<8x16xf32> -> vector<8x16xf32>
    %c0_70 = arith.constant 0 : index
    %c0_71 = arith.constant 0 : index
    %c0_72 = arith.constant 0 : index
    %89 = vector.load %arg15[%c0_70, %c0_71, %c0_72] : memref<9x8x8xbf16, #tpu.memory_space<vmem>>, vector<1x8x8xbf16>
    %90 = vector.shape_cast %89 : vector<1x8x8xbf16> to vector<8x8xbf16>
    %91 = arith.truncf %88 : vector<8x16xf32> to vector<8x16xbf16>
    %cst_73 = arith.constant dense<0.000000e+00> : vector<8x16xf32>
    %92 = tpu.matmul %90, %91, %cst_73 {dimension_numbers = #tpu.dot_dimension_numbers<[1], [0], [0], [1], [0, 0, 1, 1], [], []>} : vector<8x8xbf16>, vector<8x16xbf16>, vector<8x16xf32> -> vector<8x16xf32>
    %93 = arith.addf %85, %92 : vector<8x16xf32>
    %c3 = arith.constant 3 : index
    %c0_74 = arith.constant 0 : index
    %c0_75 = arith.constant 0 : index
    %94 = vector.load %arg16[%c3, %c0_74, %c0_75] : memref<18x16x16xf32, #tpu.memory_space<vmem>>, vector<1x16x16xf32>
    %95 = vector.shape_cast %94 : vector<1x16x16xf32> to vector<16x16xf32>
    %cst_76 = arith.constant dense<0.000000e+00> : vector<8x16xf32>
    %96 = tpu.matmul %76, %95, %cst_76 {dimension_numbers = #tpu.dot_dimension_numbers<[1], [0], [0], [1], [0, 0, 1, 1], [], []>} : vector<8x16xf32>, vector<16x16xf32>, vector<8x16xf32> -> vector<8x16xf32>
    %c3_77 = arith.constant 3 : index
    %c0_78 = arith.constant 0 : index
    %c0_79 = arith.constant 0 : index
    %97 = vector.load %arg15[%c3_77, %c0_78, %c0_79] : memref<9x8x8xbf16, #tpu.memory_space<vmem>>, vector<1x8x8xbf16>
    %98 = vector.shape_cast %97 : vector<1x8x8xbf16> to vector<8x8xbf16>
    %99 = arith.truncf %96 : vector<8x16xf32> to vector<8x16xbf16>
    %cst_80 = arith.constant dense<0.000000e+00> : vector<8x16xf32>
    %100 = tpu.matmul %98, %99, %cst_80 {dimension_numbers = #tpu.dot_dimension_numbers<[1], [0], [0], [1], [0, 0, 1, 1], [], []>} : vector<8x8xbf16>, vector<8x16xbf16>, vector<8x16xf32> -> vector<8x16xf32>
    %101 = arith.addf %93, %100 : vector<8x16xf32>
    %c6 = arith.constant 6 : index
    %c0_81 = arith.constant 0 : index
    %c0_82 = arith.constant 0 : index
    %102 = vector.load %arg16[%c6, %c0_81, %c0_82] : memref<18x16x16xf32, #tpu.memory_space<vmem>>, vector<1x16x16xf32>
    %103 = vector.shape_cast %102 : vector<1x16x16xf32> to vector<16x16xf32>
    %cst_83 = arith.constant dense<0.000000e+00> : vector<8x16xf32>
    %104 = tpu.matmul %78, %103, %cst_83 {dimension_numbers = #tpu.dot_dimension_numbers<[1], [0], [0], [1], [0, 0, 1, 1], [], []>} : vector<8x16xf32>, vector<16x16xf32>, vector<8x16xf32> -> vector<8x16xf32>
    %c6_84 = arith.constant 6 : index
    %c0_85 = arith.constant 0 : index
    %c0_86 = arith.constant 0 : index
    %105 = vector.load %arg15[%c6_84, %c0_85, %c0_86] : memref<9x8x8xbf16, #tpu.memory_space<vmem>>, vector<1x8x8xbf16>
    %106 = vector.shape_cast %105 : vector<1x8x8xbf16> to vector<8x8xbf16>
    %107 = arith.truncf %104 : vector<8x16xf32> to vector<8x16xbf16>
    %cst_87 = arith.constant dense<0.000000e+00> : vector<8x16xf32>
    %108 = tpu.matmul %106, %107, %cst_87 {dimension_numbers = #tpu.dot_dimension_numbers<[1], [0], [0], [1], [0, 0, 1, 1], [], []>} : vector<8x8xbf16>, vector<8x16xbf16>, vector<8x16xf32> -> vector<8x16xf32>
    %109 = arith.addf %101, %108 : vector<8x16xf32>
    %cst_88 = arith.constant 0.000000e+00 : f32
    %110 = vector.broadcast %cst_88 : f32 to vector<8x16xf32>
    %111 = arith.maximumf %109, %110 : vector<8x16xf32>
    %cst_89 = arith.constant 0.000000e+00 : f32
    %112 = vector.shape_cast %2 : vector<8x1xi1> to vector<8x1xi1>
    %113 = vector.broadcast %112 : vector<8x1xi1> to vector<8x16xi1>
    %114 = vector.broadcast %cst_89 : f32 to vector<8x16xf32>
    %115 = arith.select %113, %111, %114 : vector<8x16xi1>, vector<8x16xf32>
    %c1_90 = arith.constant 1 : index
    %c0_91 = arith.constant 0 : index
    %c0_92 = arith.constant 0 : index
    %116 = vector.load %arg18[%c1_90, %c0_91, %c0_92] : memref<6x16x16xf32, #tpu.memory_space<vmem>>, vector<1x16x16xf32>
    %117 = vector.shape_cast %116 : vector<1x16x16xf32> to vector<16x16xf32>
    %cst_93 = arith.constant dense<0.000000e+00> : vector<8x16xf32>
    %118 = tpu.matmul %76, %117, %cst_93 {dimension_numbers = #tpu.dot_dimension_numbers<[1], [0], [0], [1], [0, 0, 1, 1], [], []>} : vector<8x16xf32>, vector<16x16xf32>, vector<8x16xf32> -> vector<8x16xf32>
    %c1_94 = arith.constant 1 : index
    %c0_95 = arith.constant 0 : index
    %c0_96 = arith.constant 0 : index
    %119 = vector.load %arg17[%c1_94, %c0_95, %c0_96] : memref<6x1x16xf32, #tpu.memory_space<vmem>>, vector<1x1x16xf32>
    %120 = vector.shape_cast %119 : vector<1x1x16xf32> to vector<1x16xf32>
    %121 = vector.broadcast %120 : vector<1x16xf32> to vector<8x16xf32>
    %122 = arith.addf %118, %121 : vector<8x16xf32>
    %c1_97 = arith.constant 1 : index
    %c0_98 = arith.constant 0 : index
    %c0_99 = arith.constant 0 : index
    %123 = vector.load %arg16[%c1_97, %c0_98, %c0_99] : memref<18x16x16xf32, #tpu.memory_space<vmem>>, vector<1x16x16xf32>
    %124 = vector.shape_cast %123 : vector<1x16x16xf32> to vector<16x16xf32>
    %cst_100 = arith.constant dense<0.000000e+00> : vector<8x16xf32>
    %125 = tpu.matmul %74, %124, %cst_100 {dimension_numbers = #tpu.dot_dimension_numbers<[1], [0], [0], [1], [0, 0, 1, 1], [], []>} : vector<8x16xf32>, vector<16x16xf32>, vector<8x16xf32> -> vector<8x16xf32>
    %c1_101 = arith.constant 1 : index
    %c0_102 = arith.constant 0 : index
    %c0_103 = arith.constant 0 : index
    %126 = vector.load %arg15[%c1_101, %c0_102, %c0_103] : memref<9x8x8xbf16, #tpu.memory_space<vmem>>, vector<1x8x8xbf16>
    %127 = vector.shape_cast %126 : vector<1x8x8xbf16> to vector<8x8xbf16>
    %128 = arith.truncf %125 : vector<8x16xf32> to vector<8x16xbf16>
    %cst_104 = arith.constant dense<0.000000e+00> : vector<8x16xf32>
    %129 = tpu.matmul %127, %128, %cst_104 {dimension_numbers = #tpu.dot_dimension_numbers<[1], [0], [0], [1], [0, 0, 1, 1], [], []>} : vector<8x8xbf16>, vector<8x16xbf16>, vector<8x16xf32> -> vector<8x16xf32>
    %130 = arith.addf %122, %129 : vector<8x16xf32>
    %c4 = arith.constant 4 : index
    %c0_105 = arith.constant 0 : index
    %c0_106 = arith.constant 0 : index
    %131 = vector.load %arg16[%c4, %c0_105, %c0_106] : memref<18x16x16xf32, #tpu.memory_space<vmem>>, vector<1x16x16xf32>
    %132 = vector.shape_cast %131 : vector<1x16x16xf32> to vector<16x16xf32>
    %cst_107 = arith.constant dense<0.000000e+00> : vector<8x16xf32>
    %133 = tpu.matmul %76, %132, %cst_107 {dimension_numbers = #tpu.dot_dimension_numbers<[1], [0], [0], [1], [0, 0, 1, 1], [], []>} : vector<8x16xf32>, vector<16x16xf32>, vector<8x16xf32> -> vector<8x16xf32>
    %c4_108 = arith.constant 4 : index
    %c0_109 = arith.constant 0 : index
    %c0_110 = arith.constant 0 : index
    %134 = vector.load %arg15[%c4_108, %c0_109, %c0_110] : memref<9x8x8xbf16, #tpu.memory_space<vmem>>, vector<1x8x8xbf16>
    %135 = vector.shape_cast %134 : vector<1x8x8xbf16> to vector<8x8xbf16>
    %136 = arith.truncf %133 : vector<8x16xf32> to vector<8x16xbf16>
    %cst_111 = arith.constant dense<0.000000e+00> : vector<8x16xf32>
    %137 = tpu.matmul %135, %136, %cst_111 {dimension_numbers = #tpu.dot_dimension_numbers<[1], [0], [0], [1], [0, 0, 1, 1], [], []>} : vector<8x8xbf16>, vector<8x16xbf16>, vector<8x16xf32> -> vector<8x16xf32>
    %138 = arith.addf %130, %137 : vector<8x16xf32>
    %c7 = arith.constant 7 : index
    %c0_112 = arith.constant 0 : index
    %c0_113 = arith.constant 0 : index
    %139 = vector.load %arg16[%c7, %c0_112, %c0_113] : memref<18x16x16xf32, #tpu.memory_space<vmem>>, vector<1x16x16xf32>
    %140 = vector.shape_cast %139 : vector<1x16x16xf32> to vector<16x16xf32>
    %cst_114 = arith.constant dense<0.000000e+00> : vector<8x16xf32>
    %141 = tpu.matmul %78, %140, %cst_114 {dimension_numbers = #tpu.dot_dimension_numbers<[1], [0], [0], [1], [0, 0, 1, 1], [], []>} : vector<8x16xf32>, vector<16x16xf32>, vector<8x16xf32> -> vector<8x16xf32>
    %c7_115 = arith.constant 7 : index
    %c0_116 = arith.constant 0 : index
    %c0_117 = arith.constant 0 : index
    %142 = vector.load %arg15[%c7_115, %c0_116, %c0_117] : memref<9x8x8xbf16, #tpu.memory_space<vmem>>, vector<1x8x8xbf16>
    %143 = vector.shape_cast %142 : vector<1x8x8xbf16> to vector<8x8xbf16>
    %144 = arith.truncf %141 : vector<8x16xf32> to vector<8x16xbf16>
    %cst_118 = arith.constant dense<0.000000e+00> : vector<8x16xf32>
    %145 = tpu.matmul %143, %144, %cst_118 {dimension_numbers = #tpu.dot_dimension_numbers<[1], [0], [0], [1], [0, 0, 1, 1], [], []>} : vector<8x8xbf16>, vector<8x16xbf16>, vector<8x16xf32> -> vector<8x16xf32>
    %146 = arith.addf %138, %145 : vector<8x16xf32>
    %cst_119 = arith.constant 0.000000e+00 : f32
    %147 = vector.broadcast %cst_119 : f32 to vector<8x16xf32>
    %148 = arith.maximumf %146, %147 : vector<8x16xf32>
    %cst_120 = arith.constant 0.000000e+00 : f32
    %149 = vector.shape_cast %4 : vector<8x1xi1> to vector<8x1xi1>
    %150 = vector.broadcast %149 : vector<8x1xi1> to vector<8x16xi1>
    %151 = vector.broadcast %cst_120 : f32 to vector<8x16xf32>
    %152 = arith.select %150, %148, %151 : vector<8x16xi1>, vector<8x16xf32>
    %c2_121 = arith.constant 2 : index
    %c0_122 = arith.constant 0 : index
    %c0_123 = arith.constant 0 : index
    %153 = vector.load %arg18[%c2_121, %c0_122, %c0_123] : memref<6x16x16xf32, #tpu.memory_space<vmem>>, vector<1x16x16xf32>
    %154 = vector.shape_cast %153 : vector<1x16x16xf32> to vector<16x16xf32>
    %cst_124 = arith.constant dense<0.000000e+00> : vector<8x16xf32>
    %155 = tpu.matmul %78, %154, %cst_124 {dimension_numbers = #tpu.dot_dimension_numbers<[1], [0], [0], [1], [0, 0, 1, 1], [], []>} : vector<8x16xf32>, vector<16x16xf32>, vector<8x16xf32> -> vector<8x16xf32>
    %c2_125 = arith.constant 2 : index
    %c0_126 = arith.constant 0 : index
    %c0_127 = arith.constant 0 : index
    %156 = vector.load %arg17[%c2_125, %c0_126, %c0_127] : memref<6x1x16xf32, #tpu.memory_space<vmem>>, vector<1x1x16xf32>
    %157 = vector.shape_cast %156 : vector<1x1x16xf32> to vector<1x16xf32>
    %158 = vector.broadcast %157 : vector<1x16xf32> to vector<8x16xf32>
    %159 = arith.addf %155, %158 : vector<8x16xf32>
    %c2_128 = arith.constant 2 : index
    %c0_129 = arith.constant 0 : index
    %c0_130 = arith.constant 0 : index
    %160 = vector.load %arg16[%c2_128, %c0_129, %c0_130] : memref<18x16x16xf32, #tpu.memory_space<vmem>>, vector<1x16x16xf32>
    %161 = vector.shape_cast %160 : vector<1x16x16xf32> to vector<16x16xf32>
    %cst_131 = arith.constant dense<0.000000e+00> : vector<8x16xf32>
    %162 = tpu.matmul %74, %161, %cst_131 {dimension_numbers = #tpu.dot_dimension_numbers<[1], [0], [0], [1], [0, 0, 1, 1], [], []>} : vector<8x16xf32>, vector<16x16xf32>, vector<8x16xf32> -> vector<8x16xf32>
    %c2_132 = arith.constant 2 : index
    %c0_133 = arith.constant 0 : index
    %c0_134 = arith.constant 0 : index
    %163 = vector.load %arg15[%c2_132, %c0_133, %c0_134] : memref<9x8x8xbf16, #tpu.memory_space<vmem>>, vector<1x8x8xbf16>
    %164 = vector.shape_cast %163 : vector<1x8x8xbf16> to vector<8x8xbf16>
    %165 = arith.truncf %162 : vector<8x16xf32> to vector<8x16xbf16>
    %cst_135 = arith.constant dense<0.000000e+00> : vector<8x16xf32>
    %166 = tpu.matmul %164, %165, %cst_135 {dimension_numbers = #tpu.dot_dimension_numbers<[1], [0], [0], [1], [0, 0, 1, 1], [], []>} : vector<8x8xbf16>, vector<8x16xbf16>, vector<8x16xf32> -> vector<8x16xf32>
    %167 = arith.addf %159, %166 : vector<8x16xf32>
    %c5 = arith.constant 5 : index
    %c0_136 = arith.constant 0 : index
    %c0_137 = arith.constant 0 : index
    %168 = vector.load %arg16[%c5, %c0_136, %c0_137] : memref<18x16x16xf32, #tpu.memory_space<vmem>>, vector<1x16x16xf32>
    %169 = vector.shape_cast %168 : vector<1x16x16xf32> to vector<16x16xf32>
    %cst_138 = arith.constant dense<0.000000e+00> : vector<8x16xf32>
    %170 = tpu.matmul %76, %169, %cst_138 {dimension_numbers = #tpu.dot_dimension_numbers<[1], [0], [0], [1], [0, 0, 1, 1], [], []>} : vector<8x16xf32>, vector<16x16xf32>, vector<8x16xf32> -> vector<8x16xf32>
    %c5_139 = arith.constant 5 : index
    %c0_140 = arith.constant 0 : index
    %c0_141 = arith.constant 0 : index
    %171 = vector.load %arg15[%c5_139, %c0_140, %c0_141] : memref<9x8x8xbf16, #tpu.memory_space<vmem>>, vector<1x8x8xbf16>
    %172 = vector.shape_cast %171 : vector<1x8x8xbf16> to vector<8x8xbf16>
    %173 = arith.truncf %170 : vector<8x16xf32> to vector<8x16xbf16>
    %cst_142 = arith.constant dense<0.000000e+00> : vector<8x16xf32>
    %174 = tpu.matmul %172, %173, %cst_142 {dimension_numbers = #tpu.dot_dimension_numbers<[1], [0], [0], [1], [0, 0, 1, 1], [], []>} : vector<8x8xbf16>, vector<8x16xbf16>, vector<8x16xf32> -> vector<8x16xf32>
    %175 = arith.addf %167, %174 : vector<8x16xf32>
    %c8 = arith.constant 8 : index
    %c0_143 = arith.constant 0 : index
    %c0_144 = arith.constant 0 : index
    %176 = vector.load %arg16[%c8, %c0_143, %c0_144] : memref<18x16x16xf32, #tpu.memory_space<vmem>>, vector<1x16x16xf32>
    %177 = vector.shape_cast %176 : vector<1x16x16xf32> to vector<16x16xf32>
    %cst_145 = arith.constant dense<0.000000e+00> : vector<8x16xf32>
    %178 = tpu.matmul %78, %177, %cst_145 {dimension_numbers = #tpu.dot_dimension_numbers<[1], [0], [0], [1], [0, 0, 1, 1], [], []>} : vector<8x16xf32>, vector<16x16xf32>, vector<8x16xf32> -> vector<8x16xf32>
    %c8_146 = arith.constant 8 : index
    %c0_147 = arith.constant 0 : index
    %c0_148 = arith.constant 0 : index
    %179 = vector.load %arg15[%c8_146, %c0_147, %c0_148] : memref<9x8x8xbf16, #tpu.memory_space<vmem>>, vector<1x8x8xbf16>
    %180 = vector.shape_cast %179 : vector<1x8x8xbf16> to vector<8x8xbf16>
    %181 = arith.truncf %178 : vector<8x16xf32> to vector<8x16xbf16>
    %cst_149 = arith.constant dense<0.000000e+00> : vector<8x16xf32>
    %182 = tpu.matmul %180, %181, %cst_149 {dimension_numbers = #tpu.dot_dimension_numbers<[1], [0], [0], [1], [0, 0, 1, 1], [], []>} : vector<8x8xbf16>, vector<8x16xbf16>, vector<8x16xf32> -> vector<8x16xf32>
    %183 = arith.addf %175, %182 : vector<8x16xf32>
    %cst_150 = arith.constant 0.000000e+00 : f32
    %184 = vector.broadcast %cst_150 : f32 to vector<8x16xf32>
    %185 = arith.maximumf %183, %184 : vector<8x16xf32>
    %cst_151 = arith.constant 0.000000e+00 : f32
    %186 = vector.shape_cast %6 : vector<8x1xi1> to vector<8x1xi1>
    %187 = vector.broadcast %186 : vector<8x1xi1> to vector<8x16xi1>
    %188 = vector.broadcast %cst_151 : f32 to vector<8x16xf32>
    %189 = arith.select %187, %185, %188 : vector<8x16xi1>, vector<8x16xf32>
    %c0_152 = arith.constant 0 : index
    %c0_153 = arith.constant 0 : index
    %c0_154 = arith.constant 0 : index
    %190 = vector.load %arg23[%c0_152, %c0_153, %c0_154] : memref<3x8x16xf32, #tpu.memory_space<vmem>>, vector<1x8x16xf32>
    %191 = vector.shape_cast %190 : vector<1x8x16xf32> to vector<8x16xf32>
    %192 = vector.shape_cast %115 : vector<8x16xf32> to vector<1x8x16xf32>
    tpu.vector_store %arg23[%c0_152, %c0_153, %c0_154], %192 {strides = array<i32>} : memref<3x8x16xf32, #tpu.memory_space<vmem>>, vector<1x8x16xf32>,
    %c1_155 = arith.constant 1 : index
    %c0_156 = arith.constant 0 : index
    %c0_157 = arith.constant 0 : index
    %193 = vector.load %arg23[%c1_155, %c0_156, %c0_157] : memref<3x8x16xf32, #tpu.memory_space<vmem>>, vector<1x8x16xf32>
    %194 = vector.shape_cast %193 : vector<1x8x16xf32> to vector<8x16xf32>
    %195 = vector.shape_cast %152 : vector<8x16xf32> to vector<1x8x16xf32>
    tpu.vector_store %arg23[%c1_155, %c0_156, %c0_157], %195 {strides = array<i32>} : memref<3x8x16xf32, #tpu.memory_space<vmem>>, vector<1x8x16xf32>,
    %c2_158 = arith.constant 2 : index
    %c0_159 = arith.constant 0 : index
    %c0_160 = arith.constant 0 : index
    %196 = vector.load %arg23[%c2_158, %c0_159, %c0_160] : memref<3x8x16xf32, #tpu.memory_space<vmem>>, vector<1x8x16xf32>
    %197 = vector.shape_cast %196 : vector<1x8x16xf32> to vector<8x16xf32>
    %198 = vector.shape_cast %189 : vector<8x16xf32> to vector<1x8x16xf32>
    tpu.vector_store %arg23[%c2_158, %c0_159, %c0_160], %198 {strides = array<i32>} : memref<3x8x16xf32, #tpu.memory_space<vmem>>, vector<1x8x16xf32>,
    %c0_161 = arith.constant 0 : index
    %c0_162 = arith.constant 0 : index
    %c0_163 = arith.constant 0 : index
    %199 = vector.load %arg23[%c0_161, %c0_162, %c0_163] : memref<3x8x16xf32, #tpu.memory_space<vmem>>, vector<1x8x16xf32>
    %200 = vector.shape_cast %199 : vector<1x8x16xf32> to vector<8x16xf32>
    %c1_164 = arith.constant 1 : index
    %c0_165 = arith.constant 0 : index
    %c0_166 = arith.constant 0 : index
    %201 = vector.load %arg23[%c1_164, %c0_165, %c0_166] : memref<3x8x16xf32, #tpu.memory_space<vmem>>, vector<1x8x16xf32>
    %202 = vector.shape_cast %201 : vector<1x8x16xf32> to vector<8x16xf32>
    %c2_167 = arith.constant 2 : index
    %c0_168 = arith.constant 0 : index
    %c0_169 = arith.constant 0 : index
    %203 = vector.load %arg23[%c2_167, %c0_168, %c0_169] : memref<3x8x16xf32, #tpu.memory_space<vmem>>, vector<1x8x16xf32>
    %204 = vector.shape_cast %203 : vector<1x8x16xf32> to vector<8x16xf32>
    %c3_170 = arith.constant 3 : index
    %c0_171 = arith.constant 0 : index
    %c0_172 = arith.constant 0 : index
    %205 = vector.load %arg18[%c3_170, %c0_171, %c0_172] : memref<6x16x16xf32, #tpu.memory_space<vmem>>, vector<1x16x16xf32>
    %206 = vector.shape_cast %205 : vector<1x16x16xf32> to vector<16x16xf32>
    %cst_173 = arith.constant dense<0.000000e+00> : vector<8x16xf32>
    %207 = tpu.matmul %200, %206, %cst_173 {dimension_numbers = #tpu.dot_dimension_numbers<[1], [0], [0], [1], [0, 0, 1, 1], [], []>} : vector<8x16xf32>, vector<16x16xf32>, vector<8x16xf32> -> vector<8x16xf32>
    %c3_174 = arith.constant 3 : index
    %c0_175 = arith.constant 0 : index
    %c0_176 = arith.constant 0 : index
    %208 = vector.load %arg17[%c3_174, %c0_175, %c0_176] : memref<6x1x16xf32, #tpu.memory_space<vmem>>, vector<1x1x16xf32>
    %209 = vector.shape_cast %208 : vector<1x1x16xf32> to vector<1x16xf32>
    %210 = vector.broadcast %209 : vector<1x16xf32> to vector<8x16xf32>
    %211 = arith.addf %207, %210 : vector<8x16xf32>
    %c9 = arith.constant 9 : index
    %c0_177 = arith.constant 0 : index
    %c0_178 = arith.constant 0 : index
    %212 = vector.load %arg16[%c9, %c0_177, %c0_178] : memref<18x16x16xf32, #tpu.memory_space<vmem>>, vector<1x16x16xf32>
    %213 = vector.shape_cast %212 : vector<1x16x16xf32> to vector<16x16xf32>
    %cst_179 = arith.constant dense<0.000000e+00> : vector<8x16xf32>
    %214 = tpu.matmul %200, %213, %cst_179 {dimension_numbers = #tpu.dot_dimension_numbers<[1], [0], [0], [1], [0, 0, 1, 1], [], []>} : vector<8x16xf32>, vector<16x16xf32>, vector<8x16xf32> -> vector<8x16xf32>
    %c0_180 = arith.constant 0 : index
    %c0_181 = arith.constant 0 : index
    %c0_182 = arith.constant 0 : index
    %215 = vector.load %arg15[%c0_180, %c0_181, %c0_182] : memref<9x8x8xbf16, #tpu.memory_space<vmem>>, vector<1x8x8xbf16>
    %216 = vector.shape_cast %215 : vector<1x8x8xbf16> to vector<8x8xbf16>
    %217 = arith.truncf %214 : vector<8x16xf32> to vector<8x16xbf16>
    %cst_183 = arith.constant dense<0.000000e+00> : vector<8x16xf32>
    %218 = tpu.matmul %216, %217, %cst_183 {dimension_numbers = #tpu.dot_dimension_numbers<[1], [0], [0], [1], [0, 0, 1, 1], [], []>} : vector<8x8xbf16>, vector<8x16xbf16>, vector<8x16xf32> -> vector<8x16xf32>
    %219 = arith.addf %211, %218 : vector<8x16xf32>
    %c12 = arith.constant 12 : index
    %c0_184 = arith.constant 0 : index
    %c0_185 = arith.constant 0 : index
    %220 = vector.load %arg16[%c12, %c0_184, %c0_185] : memref<18x16x16xf32, #tpu.memory_space<vmem>>, vector<1x16x16xf32>
    %221 = vector.shape_cast %220 : vector<1x16x16xf32> to vector<16x16xf32>
    %cst_186 = arith.constant dense<0.000000e+00> : vector<8x16xf32>
    %222 = tpu.matmul %202, %221, %cst_186 {dimension_numbers = #tpu.dot_dimension_numbers<[1], [0], [0], [1], [0, 0, 1, 1], [], []>} : vector<8x16xf32>, vector<16x16xf32>, vector<8x16xf32> -> vector<8x16xf32>
    %c3_187 = arith.constant 3 : index
    %c0_188 = arith.constant 0 : index
    %c0_189 = arith.constant 0 : index
    %223 = vector.load %arg15[%c3_187, %c0_188, %c0_189] : memref<9x8x8xbf16, #tpu.memory_space<vmem>>, vector<1x8x8xbf16>
    %224 = vector.shape_cast %223 : vector<1x8x8xbf16> to vector<8x8xbf16>
    %225 = arith.truncf %222 : vector<8x16xf32> to vector<8x16xbf16>
    %cst_190 = arith.constant dense<0.000000e+00> : vector<8x16xf32>
    %226 = tpu.matmul %224, %225, %cst_190 {dimension_numbers = #tpu.dot_dimension_numbers<[1], [0], [0], [1], [0, 0, 1, 1], [], []>} : vector<8x8xbf16>, vector<8x16xbf16>, vector<8x16xf32> -> vector<8x16xf32>
    %227 = arith.addf %219, %226 : vector<8x16xf32>
    %c15 = arith.constant 15 : index
    %c0_191 = arith.constant 0 : index
    %c0_192 = arith.constant 0 : index
    %228 = vector.load %arg16[%c15, %c0_191, %c0_192] : memref<18x16x16xf32, #tpu.memory_space<vmem>>, vector<1x16x16xf32>
    %229 = vector.shape_cast %228 : vector<1x16x16xf32> to vector<16x16xf32>
    %cst_193 = arith.constant dense<0.000000e+00> : vector<8x16xf32>
    %230 = tpu.matmul %204, %229, %cst_193 {dimension_numbers = #tpu.dot_dimension_numbers<[1], [0], [0], [1], [0, 0, 1, 1], [], []>} : vector<8x16xf32>, vector<16x16xf32>, vector<8x16xf32> -> vector<8x16xf32>
    %c6_194 = arith.constant 6 : index
    %c0_195 = arith.constant 0 : index
    %c0_196 = arith.constant 0 : index
    %231 = vector.load %arg15[%c6_194, %c0_195, %c0_196] : memref<9x8x8xbf16, #tpu.memory_space<vmem>>, vector<1x8x8xbf16>
    %232 = vector.shape_cast %231 : vector<1x8x8xbf16> to vector<8x8xbf16>
    %233 = arith.truncf %230 : vector<8x16xf32> to vector<8x16xbf16>
    %cst_197 = arith.constant dense<0.000000e+00> : vector<8x16xf32>
    %234 = tpu.matmul %232, %233, %cst_197 {dimension_numbers = #tpu.dot_dimension_numbers<[1], [0], [0], [1], [0, 0, 1, 1], [], []>} : vector<8x8xbf16>, vector<8x16xbf16>, vector<8x16xf32> -> vector<8x16xf32>
    %235 = arith.addf %227, %234 : vector<8x16xf32>
    %cst_198 = arith.constant 0.000000e+00 : f32
    %236 = vector.broadcast %cst_198 : f32 to vector<8x16xf32>
    %237 = arith.maximumf %235, %236 : vector<8x16xf32>
    %cst_199 = arith.constant 0.000000e+00 : f32
    %238 = vector.shape_cast %2 : vector<8x1xi1> to vector<8x1xi1>
    %239 = vector.broadcast %238 : vector<8x1xi1> to vector<8x16xi1>
    %240 = vector.broadcast %cst_199 : f32 to vector<8x16xf32>
    %241 = arith.select %239, %237, %240 : vector<8x16xi1>, vector<8x16xf32>
    %c4_200 = arith.constant 4 : index
    %c0_201 = arith.constant 0 : index
    %c0_202 = arith.constant 0 : index
    %242 = vector.load %arg18[%c4_200, %c0_201, %c0_202] : memref<6x16x16xf32, #tpu.memory_space<vmem>>, vector<1x16x16xf32>
    %243 = vector.shape_cast %242 : vector<1x16x16xf32> to vector<16x16xf32>
    %cst_203 = arith.constant dense<0.000000e+00> : vector<8x16xf32>
    %244 = tpu.matmul %202, %243, %cst_203 {dimension_numbers = #tpu.dot_dimension_numbers<[1], [0], [0], [1], [0, 0, 1, 1], [], []>} : vector<8x16xf32>, vector<16x16xf32>, vector<8x16xf32> -> vector<8x16xf32>
    %c4_204 = arith.constant 4 : index
    %c0_205 = arith.constant 0 : index
    %c0_206 = arith.constant 0 : index
    %245 = vector.load %arg17[%c4_204, %c0_205, %c0_206] : memref<6x1x16xf32, #tpu.memory_space<vmem>>, vector<1x1x16xf32>
    %246 = vector.shape_cast %245 : vector<1x1x16xf32> to vector<1x16xf32>
    %247 = vector.broadcast %246 : vector<1x16xf32> to vector<8x16xf32>
    %248 = arith.addf %244, %247 : vector<8x16xf32>
    %c10 = arith.constant 10 : index
    %c0_207 = arith.constant 0 : index
    %c0_208 = arith.constant 0 : index
    %249 = vector.load %arg16[%c10, %c0_207, %c0_208] : memref<18x16x16xf32, #tpu.memory_space<vmem>>, vector<1x16x16xf32>
    %250 = vector.shape_cast %249 : vector<1x16x16xf32> to vector<16x16xf32>
    %cst_209 = arith.constant dense<0.000000e+00> : vector<8x16xf32>
    %251 = tpu.matmul %200, %250, %cst_209 {dimension_numbers = #tpu.dot_dimension_numbers<[1], [0], [0], [1], [0, 0, 1, 1], [], []>} : vector<8x16xf32>, vector<16x16xf32>, vector<8x16xf32> -> vector<8x16xf32>
    %c1_210 = arith.constant 1 : index
    %c0_211 = arith.constant 0 : index
    %c0_212 = arith.constant 0 : index
    %252 = vector.load %arg15[%c1_210, %c0_211, %c0_212] : memref<9x8x8xbf16, #tpu.memory_space<vmem>>, vector<1x8x8xbf16>
    %253 = vector.shape_cast %252 : vector<1x8x8xbf16> to vector<8x8xbf16>
    %254 = arith.truncf %251 : vector<8x16xf32> to vector<8x16xbf16>
    %cst_213 = arith.constant dense<0.000000e+00> : vector<8x16xf32>
    %255 = tpu.matmul %253, %254, %cst_213 {dimension_numbers = #tpu.dot_dimension_numbers<[1], [0], [0], [1], [0, 0, 1, 1], [], []>} : vector<8x8xbf16>, vector<8x16xbf16>, vector<8x16xf32> -> vector<8x16xf32>
    %256 = arith.addf %248, %255 : vector<8x16xf32>
    %c13 = arith.constant 13 : index
    %c0_214 = arith.constant 0 : index
    %c0_215 = arith.constant 0 : index
    %257 = vector.load %arg16[%c13, %c0_214, %c0_215] : memref<18x16x16xf32, #tpu.memory_space<vmem>>, vector<1x16x16xf32>
    %258 = vector.shape_cast %257 : vector<1x16x16xf32> to vector<16x16xf32>
    %cst_216 = arith.constant dense<0.000000e+00> : vector<8x16xf32>
    %259 = tpu.matmul %202, %258, %cst_216 {dimension_numbers = #tpu.dot_dimension_numbers<[1], [0], [0], [1], [0, 0, 1, 1], [], []>} : vector<8x16xf32>, vector<16x16xf32>, vector<8x16xf32> -> vector<8x16xf32>
    %c4_217 = arith.constant 4 : index
    %c0_218 = arith.constant 0 : index
    %c0_219 = arith.constant 0 : index
    %260 = vector.load %arg15[%c4_217, %c0_218, %c0_219] : memref<9x8x8xbf16, #tpu.memory_space<vmem>>, vector<1x8x8xbf16>
    %261 = vector.shape_cast %260 : vector<1x8x8xbf16> to vector<8x8xbf16>
    %262 = arith.truncf %259 : vector<8x16xf32> to vector<8x16xbf16>
    %cst_220 = arith.constant dense<0.000000e+00> : vector<8x16xf32>
    %263 = tpu.matmul %261, %262, %cst_220 {dimension_numbers = #tpu.dot_dimension_numbers<[1], [0], [0], [1], [0, 0, 1, 1], [], []>} : vector<8x8xbf16>, vector<8x16xbf16>, vector<8x16xf32> -> vector<8x16xf32>
    %264 = arith.addf %256, %263 : vector<8x16xf32>
    %c16 = arith.constant 16 : index
    %c0_221 = arith.constant 0 : index
    %c0_222 = arith.constant 0 : index
    %265 = vector.load %arg16[%c16, %c0_221, %c0_222] : memref<18x16x16xf32, #tpu.memory_space<vmem>>, vector<1x16x16xf32>
    %266 = vector.shape_cast %265 : vector<1x16x16xf32> to vector<16x16xf32>
    %cst_223 = arith.constant dense<0.000000e+00> : vector<8x16xf32>
    %267 = tpu.matmul %204, %266, %cst_223 {dimension_numbers = #tpu.dot_dimension_numbers<[1], [0], [0], [1], [0, 0, 1, 1], [], []>} : vector<8x16xf32>, vector<16x16xf32>, vector<8x16xf32> -> vector<8x16xf32>
    %c7_224 = arith.constant 7 : index
    %c0_225 = arith.constant 0 : index
    %c0_226 = arith.constant 0 : index
    %268 = vector.load %arg15[%c7_224, %c0_225, %c0_226] : memref<9x8x8xbf16, #tpu.memory_space<vmem>>, vector<1x8x8xbf16>
    %269 = vector.shape_cast %268 : vector<1x8x8xbf16> to vector<8x8xbf16>
    %270 = arith.truncf %267 : vector<8x16xf32> to vector<8x16xbf16>
    %cst_227 = arith.constant dense<0.000000e+00> : vector<8x16xf32>
    %271 = tpu.matmul %269, %270, %cst_227 {dimension_numbers = #tpu.dot_dimension_numbers<[1], [0], [0], [1], [0, 0, 1, 1], [], []>} : vector<8x8xbf16>, vector<8x16xbf16>, vector<8x16xf32> -> vector<8x16xf32>
    %272 = arith.addf %264, %271 : vector<8x16xf32>
    %cst_228 = arith.constant 0.000000e+00 : f32
    %273 = vector.broadcast %cst_228 : f32 to vector<8x16xf32>
    %274 = arith.maximumf %272, %273 : vector<8x16xf32>
    %cst_229 = arith.constant 0.000000e+00 : f32
    %275 = vector.shape_cast %4 : vector<8x1xi1> to vector<8x1xi1>
    %276 = vector.broadcast %275 : vector<8x1xi1> to vector<8x16xi1>
    %277 = vector.broadcast %cst_229 : f32 to vector<8x16xf32>
    %278 = arith.select %276, %274, %277 : vector<8x16xi1>, vector<8x16xf32>
    %c5_230 = arith.constant 5 : index
    %c0_231 = arith.constant 0 : index
    %c0_232 = arith.constant 0 : index
    %279 = vector.load %arg18[%c5_230, %c0_231, %c0_232] : memref<6x16x16xf32, #tpu.memory_space<vmem>>, vector<1x16x16xf32>
    %280 = vector.shape_cast %279 : vector<1x16x16xf32> to vector<16x16xf32>
    %cst_233 = arith.constant dense<0.000000e+00> : vector<8x16xf32>
    %281 = tpu.matmul %204, %280, %cst_233 {dimension_numbers = #tpu.dot_dimension_numbers<[1], [0], [0], [1], [0, 0, 1, 1], [], []>} : vector<8x16xf32>, vector<16x16xf32>, vector<8x16xf32> -> vector<8x16xf32>
    %c5_234 = arith.constant 5 : index
    %c0_235 = arith.constant 0 : index
    %c0_236 = arith.constant 0 : index
    %282 = vector.load %arg17[%c5_234, %c0_235, %c0_236] : memref<6x1x16xf32, #tpu.memory_space<vmem>>, vector<1x1x16xf32>
    %283 = vector.shape_cast %282 : vector<1x1x16xf32> to vector<1x16xf32>
    %284 = vector.broadcast %283 : vector<1x16xf32> to vector<8x16xf32>
    %285 = arith.addf %281, %284 : vector<8x16xf32>
    %c11 = arith.constant 11 : index
    %c0_237 = arith.constant 0 : index
    %c0_238 = arith.constant 0 : index
    %286 = vector.load %arg16[%c11, %c0_237, %c0_238] : memref<18x16x16xf32, #tpu.memory_space<vmem>>, vector<1x16x16xf32>
    %287 = vector.shape_cast %286 : vector<1x16x16xf32> to vector<16x16xf32>
    %cst_239 = arith.constant dense<0.000000e+00> : vector<8x16xf32>
    %288 = tpu.matmul %200, %287, %cst_239 {dimension_numbers = #tpu.dot_dimension_numbers<[1], [0], [0], [1], [0, 0, 1, 1], [], []>} : vector<8x16xf32>, vector<16x16xf32>, vector<8x16xf32> -> vector<8x16xf32>
    %c2_240 = arith.constant 2 : index
    %c0_241 = arith.constant 0 : index
    %c0_242 = arith.constant 0 : index
    %289 = vector.load %arg15[%c2_240, %c0_241, %c0_242] : memref<9x8x8xbf16, #tpu.memory_space<vmem>>, vector<1x8x8xbf16>
    %290 = vector.shape_cast %289 : vector<1x8x8xbf16> to vector<8x8xbf16>
    %291 = arith.truncf %288 : vector<8x16xf32> to vector<8x16xbf16>
    %cst_243 = arith.constant dense<0.000000e+00> : vector<8x16xf32>
    %292 = tpu.matmul %290, %291, %cst_243 {dimension_numbers = #tpu.dot_dimension_numbers<[1], [0], [0], [1], [0, 0, 1, 1], [], []>} : vector<8x8xbf16>, vector<8x16xbf16>, vector<8x16xf32> -> vector<8x16xf32>
    %293 = arith.addf %285, %292 : vector<8x16xf32>
    %c14 = arith.constant 14 : index
    %c0_244 = arith.constant 0 : index
    %c0_245 = arith.constant 0 : index
    %294 = vector.load %arg16[%c14, %c0_244, %c0_245] : memref<18x16x16xf32, #tpu.memory_space<vmem>>, vector<1x16x16xf32>
    %295 = vector.shape_cast %294 : vector<1x16x16xf32> to vector<16x16xf32>
    %cst_246 = arith.constant dense<0.000000e+00> : vector<8x16xf32>
    %296 = tpu.matmul %202, %295, %cst_246 {dimension_numbers = #tpu.dot_dimension_numbers<[1], [0], [0], [1], [0, 0, 1, 1], [], []>} : vector<8x16xf32>, vector<16x16xf32>, vector<8x16xf32> -> vector<8x16xf32>
    %c5_247 = arith.constant 5 : index
    %c0_248 = arith.constant 0 : index
    %c0_249 = arith.constant 0 : index
    %297 = vector.load %arg15[%c5_247, %c0_248, %c0_249] : memref<9x8x8xbf16, #tpu.memory_space<vmem>>, vector<1x8x8xbf16>
    %298 = vector.shape_cast %297 : vector<1x8x8xbf16> to vector<8x8xbf16>
    %299 = arith.truncf %296 : vector<8x16xf32> to vector<8x16xbf16>
    %cst_250 = arith.constant dense<0.000000e+00> : vector<8x16xf32>
    %300 = tpu.matmul %298, %299, %cst_250 {dimension_numbers = #tpu.dot_dimension_numbers<[1], [0], [0], [1], [0, 0, 1, 1], [], []>} : vector<8x8xbf16>, vector<8x16xbf16>, vector<8x16xf32> -> vector<8x16xf32>
    %301 = arith.addf %293, %300 : vector<8x16xf32>
    %c17 = arith.constant 17 : index
    %c0_251 = arith.constant 0 : index
    %c0_252 = arith.constant 0 : index
    %302 = vector.load %arg16[%c17, %c0_251, %c0_252] : memref<18x16x16xf32, #tpu.memory_space<vmem>>, vector<1x16x16xf32>
    %303 = vector.shape_cast %302 : vector<1x16x16xf32> to vector<16x16xf32>
    %cst_253 = arith.constant dense<0.000000e+00> : vector<8x16xf32>
    %304 = tpu.matmul %204, %303, %cst_253 {dimension_numbers = #tpu.dot_dimension_numbers<[1], [0], [0], [1], [0, 0, 1, 1], [], []>} : vector<8x16xf32>, vector<16x16xf32>, vector<8x16xf32> -> vector<8x16xf32>
    %c8_254 = arith.constant 8 : index
    %c0_255 = arith.constant 0 : index
    %c0_256 = arith.constant 0 : index
    %305 = vector.load %arg15[%c8_254, %c0_255, %c0_256] : memref<9x8x8xbf16, #tpu.memory_space<vmem>>, vector<1x8x8xbf16>
    %306 = vector.shape_cast %305 : vector<1x8x8xbf16> to vector<8x8xbf16>
    %307 = arith.truncf %304 : vector<8x16xf32> to vector<8x16xbf16>
    %cst_257 = arith.constant dense<0.000000e+00> : vector<8x16xf32>
    %308 = tpu.matmul %306, %307, %cst_257 {dimension_numbers = #tpu.dot_dimension_numbers<[1], [0], [0], [1], [0, 0, 1, 1], [], []>} : vector<8x8xbf16>, vector<8x16xbf16>, vector<8x16xf32> -> vector<8x16xf32>
    %309 = arith.addf %301, %308 : vector<8x16xf32>
    %cst_258 = arith.constant 0.000000e+00 : f32
    %310 = vector.broadcast %cst_258 : f32 to vector<8x16xf32>
    %311 = arith.maximumf %309, %310 : vector<8x16xf32>
    %cst_259 = arith.constant 0.000000e+00 : f32
    %312 = vector.shape_cast %6 : vector<8x1xi1> to vector<8x1xi1>
    %313 = vector.broadcast %312 : vector<8x1xi1> to vector<8x16xi1>
    %314 = vector.broadcast %cst_259 : f32 to vector<8x16xf32>
    %315 = arith.select %313, %311, %314 : vector<8x16xi1>, vector<8x16xf32>
    %c0_260 = arith.constant 0 : index
    %c0_261 = arith.constant 0 : index
    %c0_262 = arith.constant 0 : index
    %316 = vector.load %arg23[%c0_260, %c0_261, %c0_262] : memref<3x8x16xf32, #tpu.memory_space<vmem>>, vector<1x8x16xf32>
    %317 = vector.shape_cast %316 : vector<1x8x16xf32> to vector<8x16xf32>
    %318 = vector.shape_cast %241 : vector<8x16xf32> to vector<1x8x16xf32>
    tpu.vector_store %arg23[%c0_260, %c0_261, %c0_262], %318 {strides = array<i32>} : memref<3x8x16xf32, #tpu.memory_space<vmem>>, vector<1x8x16xf32>,
    %c1_263 = arith.constant 1 : index
    %c0_264 = arith.constant 0 : index
    %c0_265 = arith.constant 0 : index
    %319 = vector.load %arg23[%c1_263, %c0_264, %c0_265] : memref<3x8x16xf32, #tpu.memory_space<vmem>>, vector<1x8x16xf32>
    %320 = vector.shape_cast %319 : vector<1x8x16xf32> to vector<8x16xf32>
    %321 = vector.shape_cast %278 : vector<8x16xf32> to vector<1x8x16xf32>
    tpu.vector_store %arg23[%c1_263, %c0_264, %c0_265], %321 {strides = array<i32>} : memref<3x8x16xf32, #tpu.memory_space<vmem>>, vector<1x8x16xf32>,
    %c2_266 = arith.constant 2 : index
    %c0_267 = arith.constant 0 : index
    %c0_268 = arith.constant 0 : index
    %322 = vector.load %arg23[%c2_266, %c0_267, %c0_268] : memref<3x8x16xf32, #tpu.memory_space<vmem>>, vector<1x8x16xf32>
    %323 = vector.shape_cast %322 : vector<1x8x16xf32> to vector<8x16xf32>
    %324 = vector.shape_cast %315 : vector<8x16xf32> to vector<1x8x16xf32>
    tpu.vector_store %arg23[%c2_266, %c0_267, %c0_268], %324 {strides = array<i32>} : memref<3x8x16xf32, #tpu.memory_space<vmem>>, vector<1x8x16xf32>,
    %c0_269 = arith.constant 0 : index
    %c0_270 = arith.constant 0 : index
    %c0_271 = arith.constant 0 : index
    %325 = vector.load %arg23[%c0_269, %c0_270, %c0_271] : memref<3x8x16xf32, #tpu.memory_space<vmem>>, vector<1x8x16xf32>
    %326 = vector.shape_cast %325 : vector<1x8x16xf32> to vector<8x16xf32>
    %c0_272 = arith.constant 0 : index
    %c0_273 = arith.constant 0 : index
    %c0_274 = arith.constant 0 : index
    %327 = vector.load %arg19[%c0_272, %c0_273, %c0_274] : memref<2x16x1xf32, #tpu.memory_space<vmem>>, vector<1x16x1xf32>
    %328 = vector.shape_cast %327 : vector<1x16x1xf32> to vector<16x1xf32>
    %cst_275 = arith.constant dense<0.000000e+00> : vector<8x1xf32>
    %329 = tpu.matmul %326, %328, %cst_275 {dimension_numbers = #tpu.dot_dimension_numbers<[1], [0], [0], [1], [0, 0, 1, 1], [], []>} : vector<8x16xf32>, vector<16x1xf32>, vector<8x1xf32> -> vector<8x1xf32>
    %c0_276 = arith.constant 0 : index
    %c0_277 = arith.constant 0 : index
    %c0_278 = arith.constant 0 : index
    %330 = vector.load %arg20[%c0_276, %c0_277, %c0_278] : memref<2x1x1xf32, #tpu.memory_space<vmem>>, vector<1x1x1xf32>
    %331 = vector.shape_cast %330 : vector<1x1x1xf32> to vector<1x1xf32>
    %332 = vector.broadcast %331 : vector<1x1xf32> to vector<8x1xf32>
    %333 = arith.addf %329, %332 : vector<8x1xf32>
    %c0_279 = arith.constant 0 : index
    %c0_280 = arith.constant 0 : index
    %334 = vector.load %arg21[%c0_279, %c0_280] : memref<8x1xf32, #tpu.memory_space<vmem>>, vector<8x1xf32>
    tpu.vector_store %arg21[%c0_279, %c0_280], %333 {strides = array<i32>} : memref<8x1xf32, #tpu.memory_space<vmem>>, vector<8x1xf32>,
    %c1_281 = arith.constant 1 : index
    %c0_282 = arith.constant 0 : index
    %c0_283 = arith.constant 0 : index
    %335 = vector.load %arg23[%c1_281, %c0_282, %c0_283] : memref<3x8x16xf32, #tpu.memory_space<vmem>>, vector<1x8x16xf32>
    %336 = vector.shape_cast %335 : vector<1x8x16xf32> to vector<8x16xf32>
    %c1_284 = arith.constant 1 : index
    %c0_285 = arith.constant 0 : index
    %c0_286 = arith.constant 0 : index
    %337 = vector.load %arg19[%c1_284, %c0_285, %c0_286] : memref<2x16x1xf32, #tpu.memory_space<vmem>>, vector<1x16x1xf32>
    %338 = vector.shape_cast %337 : vector<1x16x1xf32> to vector<16x1xf32>
    %cst_287 = arith.constant dense<0.000000e+00> : vector<8x1xf32>
    %339 = tpu.matmul %336, %338, %cst_287 {dimension_numbers = #tpu.dot_dimension_numbers<[1], [0], [0], [1], [0, 0, 1, 1], [], []>} : vector<8x16xf32>, vector<16x1xf32>, vector<8x1xf32> -> vector<8x1xf32>
    %c1_288 = arith.constant 1 : index
    %c0_289 = arith.constant 0 : index
    %c0_290 = arith.constant 0 : index
    %340 = vector.load %arg20[%c1_288, %c0_289, %c0_290] : memref<2x1x1xf32, #tpu.memory_space<vmem>>, vector<1x1x1xf32>
    %341 = vector.shape_cast %340 : vector<1x1x1xf32> to vector<1x1xf32>
    %342 = vector.broadcast %341 : vector<1x1xf32> to vector<8x1xf32>
    %343 = arith.addf %339, %342 : vector<8x1xf32>
    %c0_291 = arith.constant 0 : index
    %c0_292 = arith.constant 0 : index
    %344 = vector.load %arg22[%c0_291, %c0_292] : memref<8x1xf32, #tpu.memory_space<vmem>>, vector<8x1xf32>
    tpu.vector_store %arg22[%c0_291, %c0_292], %343 {strides = array<i32>} : memref<8x1xf32, #tpu.memory_space<vmem>>, vector<8x1xf32>,
    return
  }
}

</mosaic_0001>

<bundles_post_ra>
// kernel: tpu_custom_call.1
= control target key start
LH: loop header
LB: loop body
LE: loop exit
PB: predicated region body
PF: predicated region fallthrough
CT: control target
= control target key end

     0   :  { %vm94_vm0 = vcmask 1044480   ;;  %vm90_vm1 = vcmask 39936   ;;  %v4258_v0 = vmov 0.0   ;;  %vm4259_vm2 = vmmov 0   ;;  %s4973_s3 = inlined_call_operand.vmem [shape: f32[5,32], index: 3, kind: input, shape index: {}]   ;;  %s4974_s0 = inlined_call_operand.vmem [shape: f32[8,5], index: 0, kind: input, shape index: {}]   ;;  %s4975_s5 = inlined_call_operand.vmem [shape: f32[32,16], index: 5, kind: input, shape index: {}]   ;;  %s4976_s7 = inlined_call_operand.vmem [shape: f32[7,32], index: 7, kind: input, shape index: {}]   ;;  %s4977_s1 = inlined_call_operand.vmem [shape: f32[8,7], index: 1, kind: input, shape index: {}]   ;;  %s4978_s9 = inlined_call_operand.vmem [shape: f32[32,16], index: 9, kind: input, shape index: {}]   ;;  %s4979_s4 = inlined_call_operand.vmem [shape: f32[1,32], index: 4, kind: input, shape index: {}]   ;;  %s4980_s11 = inlined_call_operand.vmem [shape: f32[6,32], index: 11, kind: input, shape index: {}]   ;;  %s4981_s2 = inlined_call_operand.vmem [shape: f32[8,6], index: 2, kind: input, shape index: {}]   ;;  %s4982_s8 = inlined_call_operand.vmem [shape: f32[1,32], index: 8, kind: input, shape index: {}]   ;;  %s4983_s13 = inlined_call_operand.vmem [shape: f32[32,16], index: 13, kind: input, shape index: {}]   ;;  %s4984_s18 = inlined_call_operand.vmem [shape: f32[6,16,16], index: 18, kind: input, shape index: {}]   ;;  %s4985_s6 = inlined_call_operand.vmem [shape: f32[1,16], index: 6, kind: input, shape index: {}]   ;;  %s4986_s12 = inlined_call_operand.vmem [shape: f32[1,32], index: 12, kind: input, shape index: {}]   ;;  %s4987_s16 = inlined_call_operand.vmem [shape: f32[18,16,16], index: 16, kind: input, shape index: {}]   ;;  %s4988_s10 = inlined_call_operand.vmem [shape: f32[1,16], index: 10, kind: input, shape index: {}]   ;;  %s4989_s14 = inlined_call_operand.vmem [shape: f32[1,16], index: 14, kind: input, shape index: {}]   ;;  %s4990_s15 = inlined_call_operand.vmem [shape: bf16[9,8,8], index: 15, kind: input, shape index: {}]   ;;  %s4991_s17 = inlined_call_operand.vmem [shape: f32[6,1,16], index: 17, kind: input, shape index: {}]   ;;  %s4992_s19 = inlined_call_operand.vmem [shape: f32[2,16,1], index: 19, kind: input, shape index: {}]   ;;  %s4993_s20 = inlined_call_operand.vmem [shape: f32[2,1,1], index: 20, kind: input, shape index: {}]   ;;  %s4994_s21 = inlined_call_operand.vmem [shape: f32[8,1], index: 21, kind: output, shape index: {0}]   ;;  %s4995_s22 = inlined_call_operand.vmem [shape: f32[8,1], index: 22, kind: output, shape index: {1}]  }
   0x1   :  { %4998 = sst [smem:[#allocation3_spill]] %s4973_s3  ;;  %3791 = vmatprep.subr.mxu0 %v4258_v0  ;;  %3793 = vmatprep.mubr.msk.f32.mxu0 %vm4259_vm2, %v4258_v0  ;;  %v4260_v4 = vmov 0.0|0.0   ;;  %vm273_vm3 = vcmask 1046528   ;;  %vm269_vm4 = vcmask 56320   ;;  %vm175_vm5 = vcmask 261120   ;;  %v433_v21 = vld [vmem:[%s4981_s2] sm:$0xff] }
   0x2   :  { %4999 = sst [smem:[#allocation4_spill]] %s4974_s0  ;;  %s5005_s29 = sld [smem:[#allocation3_spill]]  ;;  %4129 = vmatprep.subr.bf16.mxu1 %v4260_v4  ;;  %3804 = vmatprep.mubr.msk.f32.mxu1 %vm4259_vm2, %v4258_v0  ;;  %v434_v20 = vld [vmem:[%s4980_s11] sm:$0x3f]  ;;  %vm451_vm6 = vcmask 1045504   ;;  %vm447_vm7 = vcmask 48128   ;;  %v71_v53 = vlaneseq }
   0x3   :  { %5000 = sst [smem:[#allocation5_spill]] %s4975_s5  ;;  %s5006_s3 = sld [smem:[#allocation4_spill]]  ;;  %v3526_v24 = vld [vmem:[%s4982_s8] ss:$0 sm:$0xff]  ;;  %v437_v31 = vld [vmem:[%s4983_s13 + $0x8] sm:$0xff]  ;;  %v438_v36 = vld [vmem:[%s4983_s13 + $0x10] sm:$0xff] }
   0x4   :  { %5001 = sst [smem:[#allocation6_spill]] %s4976_s7  ;;  %v436_v30 = vld [vmem:[%s4983_s13] sm:$0xff]  ;;  %v615_v34 = vld [vmem:[%s4984_s18 + $0x8] sm:$0xff]  ;;  %v439_v37 = vld [vmem:[%s4983_s13 + $0x18] sm:$0xff]  ;;  %vm253_vm8 = vcmask 130048   ;;  %v4497_v54 = vshrl.u32 %v71_v53, 7 }
   0x5   :  { %5002 = sst [smem:[#allocation7_spill]] %s4977_s1  ;;  %v614_v32 = vld [vmem:[%s4984_s18] sm:$0xff]  ;;  %v4142_v33 = vpack.c.bf16 %v437_v31, %v436_v30  ;;  %v4145_v38 = vpack.c.bf16 %v439_v37, %v438_v36  ;;  %v697_v50 = vld [vmem:[%s4987_s16 + $0x8] sm:$0xff]  ;;  %v3540_v61 = vld [vmem:[%s4987_s16 + $0x30] sm:$0xff]  ;;  %vm774_vm11 = vcmask 1043456   ;;  %vm770_vm12 = vcmask 64512  }
   0x6   :  { %5003 = sst [smem:[#allocation8_spill]] %s4978_s9  ;;  %s5007_s9 = sld [smem:[#allocation5_spill]]  ;;  %v4148_v35 = vpack.c.bf16 %v615_v34, %v614_v32  ;;  %v3524_v39 = vld [vmem:[%s4985_s6] ss:$0 sm:$0xff]  ;;  %vm74_vm9 = vcmp.lt.s32.totalorder %v4497_v54, 6  ;;  %v3541_v62 = vld [vmem:[%s4987_s16 + $0x38] sm:$0xff] }
   0x7   :  { %5004 = sst [smem:[#allocation9_spill]] %s4979_s4  ;;  %v3531_v43 = vld [vmem:[%s4986_s12] ss:$0 sm:$0xff]  ;;  %v4154_v63 = vpack.c.bf16 %v3541_v62, %v3540_v61  ;;  %vm75_vm10 = vcmp.lt.s32.totalorder %v4497_v54, 5  ;;  %v3543_v30 = vld [vmem:[%s4990_s15 + $0xc] sm:$0xf] }
   0x8   :  { %v77_v1 = vld [vmem:[%s5005_s29] sm:$0x1f]  ;;  %s5008_s29 = sld [smem:[#allocation6_spill]]  ;;  %s5011_s5 = sld [smem:[#allocation9_spill]]  ;;  %v3566_v53 = vld [vmem:[%s4987_s16 + $0x78] sm:$0xff]  ;;  %v3576_v62 = vld [vmem:[%s4987_s16 + $0x28] sm:$0xff] }
   0x9   :  { %v76_v2 = vld [vmem:[%s5006_s3] sm:$0xff]  ;;  %3792 = vmatpush3.msk.msra.mxu0 %vm94_vm0, %v77_v1  ;;  %s5009_s3 = sld [smem:[#allocation7_spill]]  ;;  %vm3425_vm13 = vcmask 7168  }
   0xa   :  { %3794 = vmatmul.mubr.msk.f32.vlgmr.msra.gmra.mrb[0].mxu0 %vm90_vm1, %v76_v2  ;;  %3807 = vmatprep.subr.mxu0 %v4258_v0  ;;  %v696_v49 = vld [vmem:[%s4987_s16] sm:$0xff] }
   0xb   :  { %3809 = vmatprep.mubr.msk.f32.mxu0 %vm4259_vm2, %v4258_v0  ;;  %v4151_v51 = vpack.c.bf16 %v697_v50, %v696_v49  ;;  %v3529_v55 = vld [vmem:[%s4988_s10] ss:$0 sm:$0xff] }
   0xc   :  { %v79_v3 = vld [vmem:[%s5007_s9] sm:$0xff]  ;;  %v80_v5 = vld [vmem:[%s5007_s9 + $0x8] sm:$0xff]  ;;  %v81_v7 = vld [vmem:[%s5007_s9 + $0x10] sm:$0xff] }
   0xd   :  { %v4130_v6 = vpack.c.bf16 %v80_v5, %v79_v3  ;;  %v82_v8 = vld [vmem:[%s5007_s9 + $0x18] sm:$0xff]  ;;  %s5010_s9 = sld [smem:[#allocation8_spill]]  ;;  %v3534_v2 = vld [vmem:[%s4989_s14] ss:$0 sm:$0xff] }
   0xe   :  { %v4133_v9 = vpack.c.bf16 %v82_v8, %v81_v7  ;;  %v256_v10 = vld [vmem:[%s5008_s29] sm:$0x7f] }
   0xf   :  { %4131 = vmatpush3.bf16.msra.mxu1 %v4130_v6  ;;  %3808 = vmatpush3.msk.msra.mxu0 %vm273_vm3, %v256_v10  ;;  %v255_v11 = vld [vmem:[%s5009_s3] sm:$0xff] }
  0x10   :  { %4132 = vmatprep.subr.bf16.mxu1 %v4260_v4  ;;  %3810 = vmatmul.mubr.msk.f32.vlgmr.msra.gmra.mrb[2].mxu0 %vm269_vm4, %v255_v11  ;;  %v3521_v15 = vld [vmem:[%s5011_s5] ss:$0 sm:$0xff] }
  0x11   :  { %4135 = vmatprep.subr.bf16.mxu0 %v4260_v4  ;;  %3820 = vmatprep.mubr.msk.f32.mxu0 %vm4259_vm2, %v4258_v0  ;;  %v3536_v31 = vld [vmem:[%s4991_s17] ss:$0 sm:$0xff] }
  0x12   :  { %v3575_v61 = vld [vmem:[%s4987_s16 + $0x20] sm:$0xff] }
  0x13   :  { %4134 = vmatpush3.bf16.msra.mxu1 %v4133_v9  ;;  %v258_v12 = vld [vmem:[%s5010_s9] sm:$0xff]  ;;  %v259_v13 = vld [vmem:[%s5010_s9 + $0x8] sm:$0xff]  ;;  %v260_v22 = vld [vmem:[%s5010_s9 + $0x10] sm:$0xff] }
  0x14   :  { %3823 = vmatprep.subr.mxu1 %v4258_v0  ;;  %v4136_v14 = vpack.c.bf16 %v259_v13, %v258_v12  ;;  %v261_v23 = vld [vmem:[%s5010_s9 + $0x18] sm:$0xff] }
  0x15   :  { %v4139_v26 = vpack.c.bf16 %v261_v23, %v260_v22  ;;  %v3555_v23 = vld [vmem:[%s4987_s16 + $0x10] sm:$0xff] }
  0x16   :  { %4137 = vmatpush3.bf16.msra.mxu0 %v4136_v14  ;;  %v3545_v14 = vld [vmem:[%s4987_s16 + $0x60] sm:$0xff] }
  0x17   :  { %4138 = vmatprep.subr.bf16.mxu0 %v4260_v4 }
  0x1a   :  { %4140 = vmatpush3.bf16.msra.mxu0 %v4139_v26 }
  0x1b   :  { %4147 = vmatprep.subr.bf16.mxu0 %v4260_v4 }
  0xdd   :  { %v164_v16 = vpop.f32.mrb[0].mxu0 }
  0xde   :  { %v165_v17 = vadd.f32 %v3521_v15, %v164_v16  ;;  %v3795_v18 = vpop.f32.mrb[1].mxu0  ;;  %v3546_v15 = vld [vmem:[%s4987_s16 + $0x68] sm:$0xff] }
  0xdf   :  { %v4157_v18 = vpack.c.bf16 %v3546_v15, %v3545_v14 }
  0xe0   :  { %v168_v19 = vmax.f32 %v165_v17, 0.0  ;;  %v768_v17 = vld [vmem:[%s4990_s15] sm:$0xf] }
  0xe2   :  { %3805 = vmatmul.mubr.msk.f32.vlgmr.msra.gmra.mrb[0].mxu1 %vm175_vm5, %v168_v19  ;;  %v3550_v19 = vld [vmem:[%s4984_s18 + $0x10] sm:$0xff] }
  0xe3   :  { %3824 = vmatpush3.msk.msra.mxu1 %vm451_vm6, %v434_v20  ;;  %3825 = vmatprep.mubr.msk.f32.mxu1 %vm4259_vm2, %v4258_v0  ;;  %v343_v25 = vpop.f32.mrb[2].mxu0  ;;  %v3551_v20 = vld [vmem:[%s4984_s18 + $0x18] sm:$0xff] }
  0xe4   :  { %4141 = vmatprep.subr.bf16.mxu1 %v4260_v4  ;;  %v344_v27 = vadd.f32 %v3526_v24, %v343_v25  ;;  %v3811_v28 = vpop.f32.mrb[3].mxu0  ;;  %v4160_v22 = vpack.c.bf16 %v3551_v20, %v3550_v19  ;;  %v3556_v24 = vld [vmem:[%s4987_s16 + $0x18] sm:$0xff]  ;;  %v3563_v19 = vld [vmem:[%s4990_s15 + $0x10] sm:$0xf] }
  0xe5   :  { %v4163_v25 = vpack.c.bf16 %v3556_v24, %v3555_v23 }
  0xe6   :  { %3826 = vmatmul.mubr.msk.f32.vlgmr.msra.gmra.mrb[2].mxu1 %vm447_vm7, %v433_v21  ;;  %v347_v29 = vmax.f32 %v344_v27, 0.0 }
  0xe7   :  { %3836 = vmatprep.mubr.msk.f32.mxu1 %vm4259_vm2, %v4258_v0  ;;  %4143 = vmatpush3.bf16.msra.mxu1 %v4142_v33 }
  0xe8   :  { %3821 = vmatmul.mubr.msk.f32.vlgmr.msra.gmra.mrb[4].mxu0 %vm175_vm5, %v347_v29  ;;  %4144 = vmatprep.subr.bf16.mxu1 %v4260_v4 }
  0xe9   :  { %3843 = vmatprep.mubr.msk.f32.mxu0 %vm4259_vm2, %v4258_v0  ;;  %4149 = vmatpush3.bf16.msra.mxu0 %v4148_v35 }
  0xea   :  { %4150 = vmatprep.subr.bf16.mxu0 %v4260_v4 }
  0xeb   :  { %4146 = vmatpush3.bf16.msra.mxu1 %v4145_v38 }
  0xec   :  { %3853 = vmatprep.subr.bf16.mxu1 %v4258_v0 }
 0x1b5   :  { %v245_v40 = vpop.f32.mrb[0].mxu1 }
 0x1b6   :  { %v246_v41 = vadd.f32 %v3524_v39, %v245_v40  ;;  %v3806_v42 = vpop.f32.mrb[1].mxu1 }
 0x1b7   :  { %v3561_v42 = vld [vmem:[%s4987_s16 + $0x48] sm:$0xff] }
 0x1b8   :  { %v249_v44 = vmax.f32 %v246_v41, 0.0  ;;  %v3560_v41 = vld [vmem:[%s4987_s16 + $0x40] sm:$0xff] }
 0x1b9   :  { %v521_v45 = vpop.f32.mrb[2].mxu1 }
 0x1ba   :  { %254 = vst.msk [vmem:[#allocation2] sm:$0xff] %vm253_vm8, %v249_v44  ;;  %v522_v46 = vadd.f32 %v3531_v43, %v521_v45  ;;  %v3827_v47 = vpop.f32.mrb[3].mxu1  ;;  %v3548_v45 = vld [vmem:[%s4990_s15 + $0x18] sm:$0xf] }
 0x1bb   :  { %v423_v56 = vpop.f32.mrb[4].mxu0 }
 0x1bc   :  { %v525_v48 = vmax.f32 %v522_v46, 0.0  ;;  %v424_v57 = vadd.f32 %v3529_v55, %v423_v56  ;;  %v3822_v58 = vpop.f32.mrb[5].mxu0  ;;  %v4166_v46 = vpack.c.bf16 %v3561_v42, %v3560_v41  ;;  %v3558_v56 = vld [vmem:[%s4990_s15 + $0x4] sm:$0xf]  ;;  %v3595_v42 = vld [vmem:[%s4987_s16 + $0x90] sm:$0xff] }
 0x1bd   :  { %v3570_v58 = vld [vmem:[%s4984_s18 + $0x20] sm:$0xff] }
 0x1be   :  { %3837 = vmatmul.mubr.msk.f32.vlgmr.msra.gmra.mrb[4].mxu1 %vm175_vm5, %v525_v48  ;;  %v427_v59 = vmax.f32 %v424_v57, 0.0 }
 0x1bf   :  { %3855 = vmatprep.mubr.msk.bf16.mxu1 %vm4259_vm2, %v4258_v0 }
 0x1c0   :  { %v430_v60 = vsel %vm74_vm9, %v427_v59, 0.0  ;;  %v3571_v59 = vld [vmem:[%s4984_s18 + $0x28] sm:$0xff] }
 0x1c1   :  { %v4486_v52 = vld [vmem:[#allocation2] sm:$0xff]  ;;  %432 = vst.msk [vmem:[#allocation2 + $0x8] sm:$0xff] %vm253_vm8, %v430_v60  ;;  %v4172_v60 = vpack.c.bf16 %v3571_v59, %v3570_v58 }
 0x1c2   :  { %3844 = vmatmul.mubr.msk.f32.vlgmr.msra.gmra.mrb[6].mxu0 %vm253_vm8, %v4486_v52 }
 0x1c3   :  { %4152 = vmatpush3.bf16.msra.mxu0 %v4151_v51  ;;  %3850 = vmatprep.mubr.msk.f32.mxu0 %vm4259_vm2, %v4258_v0  ;;  %v3565_v51 = vld [vmem:[%s4987_s16 + $0x70] sm:$0xff] }
 0x1c4   :  { %4153 = vmatprep.subr.bf16.mxu0 %v4260_v4  ;;  %v4169_v57 = vpack.c.bf16 %v3566_v53, %v3565_v51 }
 0x1c6   :  { %3851 = vmatmul.mubr.msk.f32.vlgmr.msra.gmra.mrb[8].mxu0 %vm253_vm8, %v4486_v52 }
 0x1c7   :  { %3863 = vmatprep.mubr.msk.f32.mxu0 %vm4259_vm2, %v4258_v0  ;;  %4155 = vmatpush3.bf16.msra.mxu0 %v4154_v63  ;;  %v4175_v63 = vpack.c.bf16 %v3576_v62, %v3575_v61 }
 0x1c8   :  { %3866 = vmatprep.subr.bf16.mxu0 %v4258_v0  ;;  %v4513_v1 = vld [vmem:[#allocation2 + $0x8] sm:$0xff] }
 0x1ca   :  { %3864 = vmatmul.mubr.msk.f32.vlgmr.msra.gmra.mrb[10].mxu0 %vm253_vm8, %v4513_v1 }
 0x1cb   :  { %3868 = vmatprep.mubr.msk.bf16.mxu0 %vm4259_vm2, %v4258_v0 }
 0x291   :  { %v601_v3 = vpop.f32.mrb[4].mxu1 }
 0x292   :  { %v602_v5 = vadd.f32 %v3534_v2, %v601_v3  ;;  %v3838_v6 = vpop.f32.mrb[5].mxu1 }
 0x294   :  { %v605_v7 = vmax.f32 %v602_v5, 0.0 }
 0x295   :  { %v692_v8 = vpop.f32.mrb[6].mxu0 }
 0x296   :  { %v3845_v9 = vpop.f32.mrb[7].mxu0  ;;  %v608_v10 = vsel %vm75_vm10, %v605_v7, 0.0  ;;  %v693_v32 = vadd.f32 %v3536_v31, %v692_v8 }
 0x297   :  { %610 = vst.msk [vmem:[#allocation2 + $0x10] sm:$0xff] %vm253_vm8, %v608_v10  ;;  %v3553_v9 = vld [vmem:[%s4991_s17 + $0x1] ss:$0 sm:$0xff] }
 0x299   :  { %v764_v11 = vpop.f32.mrb[8].mxu0 }
 0x29a   :  { %v769_v12 = vpack.c.bf16 %v764_v11, %v764_v11  ;;  %v3852_v13 = vpop.f32.mrb[9].mxu0 }
 0x29c   :  { %v776_v16 = vsel %vm774_vm11, %v769_v12, 0 }
 0x29d   :  { %3854 = vmatpush3.bf16.msra.mxu1 %v776_v16  ;;  %v891_v26 = vpop.f32.mrb[10].mxu0 }
 0x29e   :  { %4156 = vmatprep.subr.bf16.mxu1 %v4260_v4  ;;  %v4547_v21 = vld [vmem:[#allocation2 + $0x10] sm:$0xff]  ;;  %v897_v27 = vpack.c.bf16 %v891_v26, %v891_v26  ;;  %v3865_v28 = vpop.f32.mrb[11].mxu0 }
 0x29f   :  { %v3581_v28 = vld [vmem:[%s4987_s16 + $0x58] sm:$0xff] }
 0x2a0   :  { %3856 = vmatmul.mubr.msk.bf16.vlgmr.msra.gmra.mrb[8].mxu1 %vm770_vm12, %v768_v17  ;;  %v902_v29 = vsel %vm774_vm11, %v897_v27, 0  ;;  %v3580_v27 = vld [vmem:[%s4987_s16 + $0x50] sm:$0xff] }
 0x2a1   :  { %4158 = vmatpush3.bf16.msra.mxu1 %v4157_v18  ;;  %3876 = vmatprep.mubr.msk.f32.mxu1 %vm4259_vm2, %v4258_v0  ;;  %v4178_v31 = vpack.c.bf16 %v3581_v28, %v3580_v27 }
 0x2a2   :  { %4159 = vmatprep.subr.bf16.mxu1 %v4260_v4  ;;  %3867 = vmatpush3.bf16.msra.mxu0 %v902_v29 }
 0x2a3   :  { %3879 = vmatprep.subr.bf16.mxu0 %v4258_v0 }
 0x2a5   :  { %3869 = vmatmul.mubr.msk.bf16.vlgmr.msra.gmra.mrb[12].mxu0 %vm770_vm12, %v3543_v30  ;;  %v3568_v30 = vld [vmem:[%s4990_s15 + $0x1c] sm:$0xf] }
 0x2a6   :  { %3881 = vmatprep.mubr.msk.bf16.mxu0 %vm4259_vm2, %v4258_v0 }
 0x2a8   :  { %3877 = vmatmul.mubr.msk.f32.vlgmr.msra.gmra.mrb[6].mxu1 %vm253_vm8, %v4547_v21 }
 0x2a9   :  { %4161 = vmatpush3.bf16.msra.mxu1 %v4160_v22  ;;  %3889 = vmatprep.mubr.msk.f32.mxu1 %vm4259_vm2, %v4258_v0 }
 0x2aa   :  { %4162 = vmatprep.subr.bf16.mxu1 %v4260_v4 }
 0x2ac   :  { %3890 = vmatmul.mubr.msk.f32.vlgmr.msra.gmra.mrb[12].mxu1 %vm253_vm8, %v4513_v1 }
 0x2ad   :  { %4164 = vmatpush3.bf16.msra.mxu1 %v4163_v25  ;;  %3896 = vmatprep.mubr.msk.f32.mxu1 %vm4259_vm2, %v4258_v0 }
 0x2ae   :  { %3899 = vmatprep.subr.bf16.mxu1 %v4258_v0 }
 0x2b0   :  { %3897 = vmatmul.mubr.msk.f32.vlgmr.msra.gmra.mrb[14].mxu1 %vm253_vm8, %v4486_v52 }
 0x2b1   :  { %3901 = vmatprep.mubr.msk.bf16.mxu1 %vm4259_vm2, %v4258_v0 }
 0x373   :  { %v812_v33 = vpop.f32.mrb[8].mxu1 }
 0x374   :  { %v818_v34 = vadd.f32 %v812_v33, %v693_v32  ;;  %v3857_v35 = vpop.f32.mrb[9].mxu1 }
 0x375   :  { %v815_v36 = vpop.f32.mrb[10].mxu1  ;;  %v3586_v35 = vld [vmem:[%s4987_s16 + $0x88] sm:$0xff] }
 0x376   :  { %v3858_v37 = vpop.f32.mrb[11].mxu1 }
 0x377   :  { %v3578_v37 = vld [vmem:[%s4990_s15 + $0x8] sm:$0xf] }
 0x37b   :  { %v1017_v38 = vpop.f32.mrb[6].mxu1 }
 0x37c   :  { %v1023_v39 = vpack.c.bf16 %v1017_v38, %v1017_v38  ;;  %v3878_v40 = vpop.f32.mrb[7].mxu1 }
 0x37d   :  { %v3591_v40 = vld [vmem:[%s4984_s18 + $0x38] sm:$0xff] }
 0x37e   :  { %v1028_v43 = vsel %vm774_vm11, %v1023_v39, 0  ;;  %v3590_v39 = vld [vmem:[%s4984_s18 + $0x30] sm:$0xff] }
 0x37f   :  { %3880 = vmatpush3.bf16.msra.mxu0 %v1028_v43  ;;  %v1150_v44 = vpop.f32.mrb[12].mxu1  ;;  %v4184_v41 = vpack.c.bf16 %v3591_v40, %v3590_v39  ;;  %v3596_v43 = vld [vmem:[%s4987_s16 + $0x98] sm:$0xff]  ;;  %v3610_v39 = vld [vmem:[%s4984_s18 + $0x48] sm:$0xff] }
 0x380   :  { %v3891_v47 = vpop.f32.mrb[13].mxu1  ;;  %4165 = vmatprep.subr.bf16.mxu0 %v4260_v4  ;;  %v1151_v10 = vadd.f32 %v3553_v9, %v1150_v44 }
 0x382   :  { %3882 = vmatmul.mubr.msk.bf16.vlgmr.msra.gmra.mrb[12].mxu0 %vm770_vm12, %v3548_v45 }
 0x383   :  { %v1223_v48 = vpop.f32.mrb[14].mxu1  ;;  %4167 = vmatpush3.bf16.msra.mxu0 %v4166_v46  ;;  %3909 = vmatprep.mubr.msk.f32.mxu0 %vm4259_vm2, %v4258_v0 }
 0x384   :  { %v1229_v49 = vpack.c.bf16 %v1223_v48, %v1223_v48  ;;  %v3898_v50 = vpop.f32.mrb[15].mxu1  ;;  %3912 = vmatprep.subr.bf16.mxu0 %v4258_v0 }
 0x386   :  { %v1234_v55 = vsel %vm774_vm11, %v1229_v49, 0 }
 0x387   :  { %3900 = vmatpush3.bf16.msra.mxu1 %v1234_v55 }
 0x388   :  { %4168 = vmatprep.subr.bf16.mxu1 %v4260_v4 }
 0x38a   :  { %3902 = vmatmul.mubr.msk.bf16.vlgmr.msra.gmra.mrb[16].mxu1 %vm770_vm12, %v3558_v56  ;;  %3910 = vmatmul.mubr.msk.f32.vlgmr.msra.gmra.mrb[16].mxu0 %vm253_vm8, %v4513_v1 }
 0x38b   :  { %4170 = vmatpush3.bf16.msra.mxu1 %v4169_v57  ;;  %3922 = vmatprep.mubr.msk.f32.mxu1 %vm4259_vm2, %v4258_v0 }
 0x38c   :  { %4171 = vmatprep.subr.bf16.mxu1 %v4260_v4  ;;  %3914 = vmatprep.mubr.msk.bf16.mxu0 %vm4259_vm2, %v4258_v0 }
 0x392   :  { %3923 = vmatmul.mubr.msk.f32.vlgmr.msra.gmra.mrb[20].mxu1 %vm253_vm8, %v4547_v21 }
 0x393   :  { %4173 = vmatpush3.bf16.msra.mxu1 %v4172_v60  ;;  %3935 = vmatprep.mubr.msk.f32.mxu1 %vm4259_vm2, %v4258_v0 }
 0x394   :  { %4174 = vmatprep.subr.bf16.mxu1 %v4260_v4 }
 0x396   :  { %3936 = vmatmul.mubr.msk.f32.vlgmr.msra.gmra.mrb[22].mxu1 %vm253_vm8, %v4547_v21 }
 0x397   :  { %4176 = vmatpush3.bf16.msra.mxu1 %v4175_v63  ;;  %3942 = vmatprep.mubr.msk.f32.mxu1 %vm4259_vm2, %v4258_v0 }
 0x398   :  { %3945 = vmatprep.subr.bf16.mxu1 %v4258_v0 }
 0x39a   :  { %3943 = vmatmul.mubr.msk.f32.vlgmr.msra.gmra.mrb[24].mxu1 %vm253_vm8, %v4486_v52 }
 0x39b   :  { %3947 = vmatprep.mubr.msk.bf16.mxu1 %vm4259_vm2, %v4258_v0 }
 0x455   :  { %v1064_v2 = vpop.f32.mrb[12].mxu0 }
 0x456   :  { %v4225_v3 = vadd.f32 %v1064_v2, %v818_v34  ;;  %v3883_v5 = vpop.f32.mrb[13].mxu0  ;;  %v3585_v34 = vld [vmem:[%s4987_s16 + $0x80] sm:$0xff] }
 0x457   :  { %v1067_v6 = vpop.f32.mrb[14].mxu0  ;;  %v4181_v38 = vpack.c.bf16 %v3586_v35, %v3585_v34 }
 0x458   :  { %v1071_v7 = vmax.f32 %v4225_v3, 0.0  ;;  %v3884_v8 = vpop.f32.mrb[15].mxu0  ;;  %v3583_v3 = vld [vmem:[%s4990_s15 + $0x14] sm:$0xf] }
 0x45a   :  { %1977 = vst.msk [vmem:[#allocation2] sm:$0xff] %vm253_vm8, %v1071_v7 }
 0x45d   :  { %v1270_v11 = vpop.f32.mrb[16].mxu1  ;;  %v1346_v12 = vpop.f32.mrb[16].mxu0 }
 0x45e   :  { %v4644_v13 = vadd.f32 %v1270_v11, %v1151_v10  ;;  %v1352_v52 = vpack.c.bf16 %v1346_v12, %v1346_v12  ;;  %v3911_v14 = vpop.f32.mrb[17].mxu0  ;;  %v3903_v15 = vpop.f32.mrb[17].mxu1 }
 0x45f   :  { %v1273_v16 = vpop.f32.mrb[18].mxu1  ;;  %v3588_v15 = vld [vmem:[%s4990_s15 + $0x20] sm:$0xf] }
 0x460   :  { %v1357_v17 = vsel %vm774_vm11, %v1352_v52, 0  ;;  %v3904_v18 = vpop.f32.mrb[19].mxu1  ;;  %v3600_v52 = vld [vmem:[%s4987_s16 + $0xc8] sm:$0xff]  ;;  %v2140_v16 = vld [vmem:[%s4990_s15] sm:$0xf] }
 0x461   :  { %3913 = vmatpush3.bf16.msra.mxu0 %v1357_v17  ;;  %v4705_v44 = vld [vmem:[#allocation2] sm:$0xff] }
 0x462   :  { %3925 = vmatprep.subr.bf16.mxu0 %v4258_v0 }
 0x464   :  { %3915 = vmatmul.mubr.msk.bf16.vlgmr.msra.gmra.mrb[20].mxu0 %vm770_vm12, %v3563_v19  ;;  %v3604_v19 = vld [vmem:[%s4987_s16 + $0xf0] sm:$0xff] }
 0x465   :  { %v1469_v20 = vpop.f32.mrb[20].mxu1  ;;  %3927 = vmatprep.mubr.msk.bf16.mxu0 %vm4259_vm2, %v4258_v0 }
 0x466   :  { %v1475_v22 = vpack.c.bf16 %v1469_v20, %v1469_v20  ;;  %v3924_v23 = vpop.f32.mrb[21].mxu1  ;;  %v3605_v20 = vld [vmem:[%s4987_s16 + $0xf8] sm:$0xff] }
 0x467   :  { %v3593_v23 = vld [vmem:[%s4991_s17 + $0x3] ss:$0 sm:$0xff] }
 0x468   :  { %v1480_v24 = vsel %vm774_vm11, %v1475_v22, 0  ;;  %v4193_v22 = vpack.c.bf16 %v3605_v20, %v3604_v19  ;;  %v3612_v19 = vld [vmem:[%s4991_s17 + $0x4] ss:$0 sm:$0xff] }
 0x469   :  { %3926 = vmatpush3.bf16.msra.mxu0 %v1480_v24  ;;  %v1602_v25 = vpop.f32.mrb[22].mxu1 }
 0x46a   :  { %v3937_v26 = vpop.f32.mrb[23].mxu1  ;;  %4177 = vmatprep.subr.bf16.mxu0 %v4260_v4 }
 0x46d   :  { %v1675_v29 = vpop.f32.mrb[24].mxu1 }
 0x46e   :  { %v1681_v32 = vpack.c.bf16 %v1675_v29, %v1675_v29  ;;  %v3944_v33 = vpop.f32.mrb[25].mxu1 }
 0x470   :  { %v1686_v36 = vsel %vm774_vm11, %v1681_v32, 0  ;;  %3928 = vmatmul.mubr.msk.bf16.vlgmr.msra.gmra.mrb[20].mxu0 %vm770_vm12, %v3568_v30 }
 0x471   :  { %3946 = vmatpush3.bf16.msra.mxu1 %v1686_v36  ;;  %4179 = vmatpush3.bf16.msra.mxu0 %v4178_v31 }
 0x472   :  { %3955 = vmatprep.mubr.msk.f32.mxu0 %vm4259_vm2, %v4258_v0  ;;  %4180 = vmatprep.subr.bf16.mxu1 %v4260_v4 }
 0x473   :  { %3958 = vmatprep.subr.bf16.mxu0 %v4258_v0 }
 0x474   :  { %3948 = vmatmul.mubr.msk.bf16.vlgmr.msra.gmra.mrb[28].mxu1 %vm770_vm12, %v3578_v37 }
 0x475   :  { %4182 = vmatpush3.bf16.msra.mxu1 %v4181_v38  ;;  %3968 = vmatprep.mubr.msk.f32.mxu1 %vm4259_vm2, %v4258_v0  ;;  %v3609_v38 = vld [vmem:[%s4984_s18 + $0x40] sm:$0xff] }
 0x476   :  { %4183 = vmatprep.subr.bf16.mxu1 %v4260_v4 }
 0x478   :  { %3956 = vmatmul.mubr.msk.f32.vlgmr.msra.gmra.mrb[18].mxu0 %vm253_vm8, %v4513_v1  ;;  %v4187_v1 = vpack.c.bf16 %v3596_v43, %v3595_v42  ;;  %v4196_v43 = vpack.c.bf16 %v3610_v39, %v3609_v38  ;;  %v3640_v38 = vld [vmem:[%s4987_s16 + $0xe8] sm:$0xff] }
 0x479   :  { %3960 = vmatprep.mubr.msk.bf16.mxu0 %vm4259_vm2, %v4258_v0 }
 0x47c   :  { %3969 = vmatmul.mubr.msk.f32.vlgmr.msra.gmra.mrb[26].mxu1 %vm253_vm8, %v4547_v21  ;;  %v3573_v21 = vld [vmem:[%s4991_s17 + $0x2] ss:$0 sm:$0xff] }
 0x47d   :  { %4185 = vmatpush3.bf16.msra.mxu1 %v4184_v41  ;;  %3981 = vmatprep.mubr.msk.f32.mxu1 %vm4259_vm2, %v4258_v0  ;;  %v1603_v49 = vadd.f32 %v3573_v21, %v1602_v25  ;;  %v3615_v21 = vld [vmem:[%s4987_s16 + $0xa8] sm:$0xff] }
 0x47e   :  { %4186 = vmatprep.subr.bf16.mxu1 %v4260_v4 }
 0x480   :  { %3982 = vmatmul.mubr.msk.f32.vlgmr.msra.gmra.mrb[32].mxu1 %vm253_vm8, %v4705_v44 }
 0x481   :  { %4188 = vmatpush3.bf16.msra.mxu1 %v4187_v1  ;;  %3988 = vmatprep.mubr.msk.f32.mxu1 %vm4259_vm2, %v4258_v0  ;;  %v3614_v1 = vld [vmem:[%s4987_s16 + $0xa0] sm:$0xff] }
 0x482   :  { %3991 = vmatprep.subr.bf16.mxu1 %v4258_v0 }
 0x484   :  { %3989 = vmatmul.mubr.msk.f32.vlgmr.msra.gmra.mrb[34].mxu1 %vm253_vm8, %v4705_v44 }
 0x485   :  { %3993 = vmatprep.mubr.msk.bf16.mxu1 %vm4259_vm2, %v4258_v0 }
 0x543   :  { %v1516_v45 = vpop.f32.mrb[20].mxu0 }
 0x544   :  { %v4226_v46 = vadd.f32 %v1516_v45, %v4644_v13  ;;  %v3929_v47 = vpop.f32.mrb[21].mxu0  ;;  %v3599_v13 = vld [vmem:[%s4987_s16 + $0xc0] sm:$0xff] }
 0x545   :  { %v1519_v48 = vpop.f32.mrb[22].mxu0  ;;  %v4190_v17 = vpack.c.bf16 %v3600_v52, %v3599_v13  ;;  %v4199_v47 = vpack.c.bf16 %v3615_v21, %v3614_v1  ;;  %v3644_v1 = vld [vmem:[%s4987_s16 + $0x110] sm:$0xff]  ;;  %v3645_v21 = vld [vmem:[%s4987_s16 + $0x118] sm:$0xff] }
 0x546   :  { %v1523_v50 = vmax.f32 %v4226_v46, 0.0  ;;  %v3930_v51 = vpop.f32.mrb[23].mxu0  ;;  %v3602_v46 = vld [vmem:[%s4990_s15 + $0xc] sm:$0xf] }
 0x547   :  { %v1722_v53 = vpop.f32.mrb[28].mxu1  ;;  %v3619_v51 = vld [vmem:[%s4987_s16 + $0xd0] sm:$0xff] }
 0x548   :  { %v1524_v55 = vsel %vm74_vm9, %v1523_v50, 0.0  ;;  %v1728_v56 = vadd.f32 %v1722_v53, %v1603_v49  ;;  %v3949_v57 = vpop.f32.mrb[29].mxu1  ;;  %v3620_v53 = vld [vmem:[%s4987_s16 + $0xd8] sm:$0xff] }
 0x549   :  { %1978 = vst.msk [vmem:[#allocation2 + $0x8] sm:$0xff] %vm253_vm8, %v1524_v55  ;;  %v1725_v58 = vpop.f32.mrb[30].mxu1  ;;  %v3607_v57 = vld [vmem:[%s4990_s15 + $0x18] sm:$0xf] }
 0x54a   :  { %v3950_v59 = vpop.f32.mrb[31].mxu1  ;;  %v4202_v58 = vpack.c.bf16 %v3620_v53, %v3619_v51 }
 0x54b   :  { %v1798_v60 = vpop.f32.mrb[18].mxu0 }
 0x54c   :  { %v1804_v61 = vpack.c.bf16 %v1798_v60, %v1798_v60  ;;  %v3957_v62 = vpop.f32.mrb[19].mxu0 }
 0x54e   :  { %v1809_v63 = vsel %vm774_vm11, %v1804_v61, 0 }
 0x54f   :  { %3959 = vmatpush3.bf16.msra.mxu0 %v1809_v63  ;;  %v1921_v2 = vpop.f32.mrb[26].mxu1  ;;  %v3624_v63 = vld [vmem:[%s4987_s16 + $0x100] sm:$0xff] }
 0x550   :  { %v1927_v5 = vpack.c.bf16 %v1921_v2, %v1921_v2  ;;  %v3970_v6 = vpop.f32.mrb[27].mxu1  ;;  %3971 = vmatprep.subr.bf16.mxu0 %v4258_v0  ;;  %v4754_v18 = vld [vmem:[#allocation2 + $0x8] sm:$0xff] }
 0x551   :  { %v3625_v2 = vld [vmem:[%s4987_s16 + $0x108] sm:$0xff] }
 0x552   :  { %v1932_v7 = vsel %vm774_vm11, %v1927_v5, 0  ;;  %3961 = vmatmul.mubr.msk.bf16.vlgmr.msra.gmra.mrb[24].mxu0 %vm770_vm12, %v3583_v3  ;;  %v3617_v5 = vld [vmem:[%s4990_s15 + $0x4] sm:$0xf]  ;;  %v4205_v6 = vpack.c.bf16 %v3625_v2, %v3624_v63 }
 0x553   :  { %3972 = vmatpush3.bf16.msra.mxu0 %v1932_v7  ;;  %v2063_v8 = vpop.f32.mrb[32].mxu1  ;;  %3973 = vmatprep.mubr.msk.bf16.mxu0 %vm4259_vm2, %v4258_v0  ;;  %v3629_v7 = vld [vmem:[%s4984_s18 + $0x50] sm:$0xff] }
 0x554   :  { %v3983_v9 = vpop.f32.mrb[33].mxu1  ;;  %4189 = vmatprep.subr.bf16.mxu0 %v4260_v4  ;;  %v2064_v24 = vadd.f32 %v3593_v23, %v2063_v8  ;;  %v3630_v8 = vld [vmem:[%s4984_s18 + $0x58] sm:$0xff] }
 0x555   :  { %v4208_v9 = vpack.c.bf16 %v3630_v8, %v3629_v7 }
 0x557   :  { %v2136_v10 = vpop.f32.mrb[34].mxu1 }
 0x558   :  { %v2141_v11 = vpack.c.bf16 %v2136_v10, %v2136_v10  ;;  %v3990_v12 = vpop.f32.mrb[35].mxu1  ;;  %v3634_v10 = vld [vmem:[%s4987_s16 + $0xb0] sm:$0xff] }
 0x55a   :  { %v2146_v14 = vsel %vm774_vm11, %v2141_v11, 0  ;;  %v3635_v11 = vld [vmem:[%s4987_s16 + $0xb8] sm:$0xff] }
 0x55b   :  { %3992 = vmatpush3.bf16.msra.mxu1 %v2146_v14  ;;  %v4211_v12 = vpack.c.bf16 %v3635_v11, %v3634_v10 }
 0x55c   :  { %4192 = vmatprep.subr.bf16.mxu1 %v4260_v4 }
 0x55e   :  { %3974 = vmatmul.mubr.msk.bf16.vlgmr.msra.gmra.mrb[24].mxu0 %vm770_vm12, %v3588_v15  ;;  %3994 = vmatmul.mubr.msk.bf16.vlgmr.msra.gmra.mrb[36].mxu1 %vm770_vm12, %v2140_v16 }
 0x55f   :  { %4191 = vmatpush3.bf16.msra.mxu0 %v4190_v17  ;;  %4001 = vmatprep.mubr.msk.f32.mxu0 %vm4259_vm2, %v4258_v0 }
 0x560   :  { %4004 = vmatprep.subr.bf16.mxu0 %v4258_v0  ;;  %4014 = vmatprep.mubr.msk.f32.mxu1 %vm4259_vm2, %v4258_v0 }
 0x561   :  { %4194 = vmatpush3.bf16.msra.mxu1 %v4193_v22 }
 0x562   :  { %4195 = vmatprep.subr.bf16.mxu1 %v4260_v4 }
 0x566   :  { %4002 = vmatmul.mubr.msk.f32.vlgmr.msra.gmra.mrb[28].mxu0 %vm253_vm8, %v4754_v18 }
 0x567   :  { %4006 = vmatprep.mubr.msk.bf16.mxu0 %vm4259_vm2, %v4258_v0 }
 0x631   :  { %v1968_v25 = vpop.f32.mrb[24].mxu0  ;;  %v2182_v26 = vpop.f32.mrb[36].mxu1 }
 0x632   :  { %v4227_v27 = vadd.f32 %v1968_v25, %v1728_v56  ;;  %v4770_v28 = vadd.f32 %v2182_v26, %v2064_v24  ;;  %v3975_v29 = vpop.f32.mrb[25].mxu0  ;;  %v3995_v30 = vpop.f32.mrb[37].mxu1 }
 0x633   :  { %v1971_v31 = vpop.f32.mrb[26].mxu0  ;;  %v2185_v32 = vpop.f32.mrb[38].mxu1  ;;  %v3622_v30 = vld [vmem:[%s4990_s15 + $0x10] sm:$0xf] }
 0x634   :  { %v1975_v33 = vmax.f32 %v4227_v27, 0.0  ;;  %v3976_v34 = vpop.f32.mrb[27].mxu0  ;;  %v3996_v35 = vpop.f32.mrb[39].mxu1 }
 0x636   :  { %v1976_v36 = vsel %vm75_vm10, %v1975_v33, 0.0 }
 0x637   :  { %1979 = vst.msk [vmem:[#allocation2 + $0x10] sm:$0xff] %vm253_vm8, %v1976_v36 }
 0x639   :  { %v2261_v37 = vpop.f32.mrb[28].mxu0 }
 0x63a   :  { %v2266_v40 = vpack.c.bf16 %v2261_v37, %v2261_v37  ;;  %v4003_v41 = vpop.f32.mrb[29].mxu0  ;;  %v3639_v37 = vld [vmem:[%s4987_s16 + $0xe0] sm:$0xff] }
 0x63b   :  { %v4214_v41 = vpack.c.bf16 %v3640_v38, %v3639_v37 }
 0x63c   :  { %v2271_v42 = vsel %vm774_vm11, %v2266_v40, 0  ;;  %v3627_v40 = vld [vmem:[%s4990_s15 + $0x1c] sm:$0xf] }
 0x63d   :  { %4005 = vmatpush3.bf16.msra.mxu0 %v2271_v42 }
 0x63e   :  { %v4788_v45 = vld [vmem:[#allocation2 + $0x10] sm:$0xff]  ;;  %4017 = vmatprep.subr.bf16.mxu0 %v4258_v0 }
 0x63f   :  { %4015 = vmatmul.mubr.msk.f32.vlgmr.msra.gmra.mrb[40].mxu1 %vm253_vm8, %v4788_v45 }
 0x640   :  { %4197 = vmatpush3.bf16.msra.mxu1 %v4196_v43  ;;  %4027 = vmatprep.mubr.msk.f32.mxu1 %vm4259_vm2, %v4258_v0 }
 0x641   :  { %4198 = vmatprep.subr.bf16.mxu1 %v4260_v4  ;;  %4007 = vmatmul.mubr.msk.bf16.vlgmr.msra.gmra.mrb[32].mxu0 %vm770_vm12, %v3602_v46 }
 0x642   :  { %4019 = vmatprep.mubr.msk.bf16.mxu0 %vm4259_vm2, %v4258_v0 }
 0x643   :  { %4028 = vmatmul.mubr.msk.f32.vlgmr.msra.gmra.mrb[42].mxu1 %vm253_vm8, %v4754_v18 }
 0x644   :  { %4200 = vmatpush3.bf16.msra.mxu1 %v4199_v47  ;;  %4034 = vmatprep.mubr.msk.f32.mxu1 %vm4259_vm2, %v4258_v0  ;;  %v3637_v47 = vld [vmem:[%s4990_s15 + $0x8] sm:$0xf] }
 0x645   :  { %4037 = vmatprep.subr.bf16.mxu1 %v4258_v0 }
 0x647   :  { %4035 = vmatmul.mubr.msk.f32.vlgmr.msra.gmra.mrb[44].mxu1 %vm253_vm8, %v4705_v44 }
 0x648   :  { %4039 = vmatprep.mubr.msk.bf16.mxu1 %vm4259_vm2, %v4258_v0 }
 0x712   :  { %v2386_v48 = vpop.f32.mrb[40].mxu1 }
 0x713   :  { %v2391_v49 = vpack.c.bf16 %v2386_v48, %v2386_v48  ;;  %v4016_v50 = vpop.f32.mrb[41].mxu1  ;;  %v4217_v48 = vpack.c.bf16 %v3645_v21, %v3644_v1 }
 0x714   :  { %v3344_v50 = vld [vmem:[%s4992_s19 + $0x8] sm:$0xff] }
 0x715   :  { %v2396_v55 = vsel %vm774_vm11, %v2391_v49, 0  ;;  %v3343_v49 = vld [vmem:[%s4992_s19] sm:$0xff] }
 0x716   :  { %4018 = vmatpush3.bf16.msra.mxu0 %v2396_v55  ;;  %v2518_v56 = vpop.f32.mrb[42].mxu1  ;;  %v4220_v51 = vpack.c.bf16 %v3344_v50, %v3343_v49 }
 0x717   :  { %v4029_v59 = vpop.f32.mrb[43].mxu1  ;;  %4201 = vmatprep.subr.bf16.mxu0 %v4260_v4  ;;  %v2519_v20 = vadd.f32 %v3612_v19, %v2518_v56 }
 0x719   :  { %4020 = vmatmul.mubr.msk.bf16.vlgmr.msra.gmra.mrb[32].mxu0 %vm770_vm12, %v3607_v57 }
 0x71a   :  { %v2591_v60 = vpop.f32.mrb[44].mxu1  ;;  %4203 = vmatpush3.bf16.msra.mxu0 %v4202_v58  ;;  %4047 = vmatprep.mubr.msk.f32.mxu0 %vm4259_vm2, %v4258_v0 }
 0x71b   :  { %v2596_v61 = vpack.c.bf16 %v2591_v60, %v2591_v60  ;;  %v4036_v62 = vpop.f32.mrb[45].mxu1  ;;  %4050 = vmatprep.subr.bf16.mxu0 %v4258_v0 }
 0x71d   :  { %v2601_v3 = vsel %vm774_vm11, %v2596_v61, 0 }
 0x71e   :  { %4038 = vmatpush3.bf16.msra.mxu1 %v2601_v3 }
 0x71f   :  { %4204 = vmatprep.subr.bf16.mxu1 %v4260_v4 }
 0x721   :  { %4040 = vmatmul.mubr.msk.bf16.vlgmr.msra.gmra.mrb[48].mxu1 %vm770_vm12, %v3617_v5  ;;  %4048 = vmatmul.mubr.msk.f32.vlgmr.msra.gmra.mrb[30].mxu0 %vm253_vm8, %v4754_v18 }
 0x722   :  { %4206 = vmatpush3.bf16.msra.mxu1 %v4205_v6  ;;  %4060 = vmatprep.mubr.msk.f32.mxu1 %vm4259_vm2, %v4258_v0 }
 0x723   :  { %4207 = vmatprep.subr.bf16.mxu1 %v4260_v4  ;;  %4052 = vmatprep.mubr.msk.bf16.mxu0 %vm4259_vm2, %v4258_v0 }
 0x729   :  { %4061 = vmatmul.mubr.msk.f32.vlgmr.msra.gmra.mrb[46].mxu1 %vm253_vm8, %v4788_v45 }
 0x72a   :  { %4209 = vmatpush3.bf16.msra.mxu1 %v4208_v9  ;;  %4073 = vmatprep.mubr.msk.f32.mxu1 %vm4259_vm2, %v4258_v0 }
 0x72b   :  { %4210 = vmatprep.subr.bf16.mxu1 %v4260_v4 }
 0x72d   :  { %4074 = vmatmul.mubr.msk.f32.vlgmr.msra.gmra.mrb[52].mxu1 %vm253_vm8, %v4788_v45 }
 0x72e   :  { %4212 = vmatpush3.bf16.msra.mxu1 %v4211_v12  ;;  %4080 = vmatprep.mubr.msk.f32.mxu1 %vm4259_vm2, %v4258_v0 }
 0x72f   :  { %4083 = vmatprep.subr.bf16.mxu1 %v4258_v0 }
 0x731   :  { %4081 = vmatmul.mubr.msk.f32.vlgmr.msra.gmra.mrb[54].mxu1 %vm253_vm8, %v4705_v44 }
 0x732   :  { %4085 = vmatprep.mubr.msk.bf16.mxu1 %vm4259_vm2, %v4258_v0 }
 0x7ec   :  { %v2432_v13 = vpop.f32.mrb[32].mxu0 }
 0x7ed   :  { %v4228_v52 = vadd.f32 %v2432_v13, %v4770_v28  ;;  %v4021_v14 = vpop.f32.mrb[33].mxu0  ;;  %v3642_v13 = vld [vmem:[%s4990_s15 + $0x14] sm:$0xf] }
 0x7ee   :  { %v2435_v15 = vpop.f32.mrb[34].mxu0 }
 0x7ef   :  { %v2439_v16 = vmax.f32 %v4228_v52, 0.0  ;;  %v4022_v17 = vpop.f32.mrb[35].mxu0 }
 0x7f1   :  { %3339 = vst.msk [vmem:[#allocation2] sm:$0xff] %vm253_vm8, %v2439_v16  ;;  %v3649_v16 = vld [vmem:[%s4993_s20] ss:$0 sm:$0xff] }
 0x7f4   :  { %v2637_v22 = vpop.f32.mrb[48].mxu1  ;;  %v2713_v23 = vpop.f32.mrb[30].mxu0 }
 0x7f5   :  { %v2643_v44 = vadd.f32 %v2637_v22, %v2519_v20  ;;  %v2718_v24 = vpack.c.bf16 %v2713_v23, %v2713_v23  ;;  %v4049_v25 = vpop.f32.mrb[31].mxu0  ;;  %v4041_v26 = vpop.f32.mrb[49].mxu1  ;;  %v3647_v23 = vld [vmem:[%s4990_s15 + $0x20] sm:$0xf] }
 0x7f6   :  { %v2640_v27 = vpop.f32.mrb[50].mxu1 }
 0x7f7   :  { %v2723_v28 = vsel %vm774_vm11, %v2718_v24, 0  ;;  %v4042_v29 = vpop.f32.mrb[51].mxu1 }
 0x7f8   :  { %4051 = vmatpush3.bf16.msra.mxu0 %v2723_v28  ;;  %v3342_v53 = vld [vmem:[#allocation2] sm:$0xff] }
 0x7f9   :  { %4063 = vmatprep.subr.bf16.mxu0 %v4258_v0 }
 0x7fb   :  { %4053 = vmatmul.mubr.msk.bf16.vlgmr.msra.gmra.mrb[36].mxu0 %vm770_vm12, %v3622_v30 }
 0x7fc   :  { %v2835_v31 = vpop.f32.mrb[46].mxu1  ;;  %4065 = vmatprep.mubr.msk.bf16.mxu0 %vm4259_vm2, %v4258_v0 }
 0x7fd   :  { %v2840_v32 = vpack.c.bf16 %v2835_v31, %v2835_v31  ;;  %v4062_v33 = vpop.f32.mrb[47].mxu1 }
 0x7ff   :  { %v2845_v34 = vsel %vm774_vm11, %v2840_v32, 0 }
 0x800   :  { %4064 = vmatpush3.bf16.msra.mxu0 %v2845_v34  ;;  %v2967_v35 = vpop.f32.mrb[52].mxu1 }
 0x801   :  { %v4075_v36 = vpop.f32.mrb[53].mxu1  ;;  %4213 = vmatprep.subr.bf16.mxu0 %v4260_v4 }
 0x804   :  { %v3040_v39 = vpop.f32.mrb[54].mxu1 }
 0x805   :  { %v3045_v42 = vpack.c.bf16 %v3040_v39, %v3040_v39  ;;  %v4082_v43 = vpop.f32.mrb[55].mxu1 }
 0x807   :  { %v3050_v46 = vsel %vm774_vm11, %v3045_v42, 0  ;;  %4066 = vmatmul.mubr.msk.bf16.vlgmr.msra.gmra.mrb[36].mxu0 %vm770_vm12, %v3627_v40 }
 0x808   :  { %4084 = vmatpush3.bf16.msra.mxu1 %v3050_v46  ;;  %4215 = vmatpush3.bf16.msra.mxu0 %v4214_v41 }
 0x809   :  { %4093 = vmatprep.mubr.msk.f32.mxu0 %vm4259_vm2, %v4258_v0  ;;  %4216 = vmatprep.subr.bf16.mxu1 %v4260_v4 }
 0x80a   :  { %4096 = vmatprep.subr.bf16.mxu0 %v4258_v0 }
 0x80b   :  { %4086 = vmatmul.mubr.msk.bf16.vlgmr.msra.gmra.mrb[56].mxu1 %vm770_vm12, %v3637_v47 }
 0x80c   :  { %4218 = vmatpush3.bf16.msra.mxu1 %v4217_v48  ;;  %4106 = vmatprep.mubr.msk.f32.mxu1 %vm4259_vm2, %v4258_v0 }
 0x80d   :  { %4219 = vmatprep.subr.bf16.mxu1 %v4260_v4 }
 0x80f   :  { %4094 = vmatmul.mubr.msk.f32.vlgmr.msra.gmra.mrb[40].mxu0 %vm253_vm8, %v4754_v18  ;;  %v3651_v18 = vld [vmem:[%s4992_s19 + $0x10] sm:$0xff] }
 0x810   :  { %4098 = vmatprep.mubr.msk.bf16.mxu0 %vm4259_vm2, %v4258_v0 }
 0x813   :  { %4107 = vmatmul.mubr.msk.f32.vlgmr.msra.gmra.mrb[60].mxu1 %vm253_vm8, %v4788_v45  ;;  %v3652_v45 = vld [vmem:[%s4992_s19 + $0x18] sm:$0xff] }
 0x814   :  { %4221 = vmatpush3.bf16.msra.mxu1 %v4220_v51  ;;  %4119 = vmatprep.mubr.msk.f32.mxu1 %vm4259_vm2, %v4258_v0  ;;  %v4223_v55 = vpack.c.bf16 %v3652_v45, %v3651_v18 }
 0x815   :  { %4222 = vmatprep.subr.bf16.mxu1 %v4260_v4  ;;  %v3632_v4 = vld [vmem:[%s4991_s17 + $0x5] ss:$0 sm:$0xff] }
 0x816   :  { %v2968_v60 = vadd.f32 %v3632_v4, %v2967_v35 }
 0x817   :  { %4120 = vmatmul.mubr.msk.f32.vlgmr.msra.gmra.mrb[62].mxu1 %vm253_vm8, %v3342_v53 }
 0x818   :  { %4126 = vmatprep.mubr.msk.f32.mxu1 %vm4259_vm2, %v4258_v0  ;;  %4224 = vmatpush3.bf16.msra.mxu1 %v4223_v55 }
 0x8da   :  { %v2881_v56 = vpop.f32.mrb[36].mxu0 }
 0x8db   :  { %v4229_v57 = vadd.f32 %v2881_v56, %v2643_v44  ;;  %v4067_v58 = vpop.f32.mrb[37].mxu0  ;;  %v3654_v44 = vld [vmem:[%s4993_s20 + $0x1] ss:$0 sm:$0xff] }
 0x8dc   :  { %v2884_v59 = vpop.f32.mrb[38].mxu0 }
 0x8dd   :  { %v2888_v61 = vmax.f32 %v4229_v57, 0.0  ;;  %v4068_v62 = vpop.f32.mrb[39].mxu0 }
 0x8de   :  { %v3086_v63 = vpop.f32.mrb[56].mxu1 }
 0x8df   :  { %v2889_v2 = vsel %vm74_vm9, %v2888_v61, 0.0  ;;  %v3092_v3 = vadd.f32 %v3086_v63, %v2968_v60  ;;  %v4087_v5 = vpop.f32.mrb[57].mxu1 }
 0x8e0   :  { %3340 = vst.msk [vmem:[#allocation2 + $0x8] sm:$0xff] %vm253_vm8, %v2889_v2  ;;  %v3089_v6 = vpop.f32.mrb[58].mxu1 }
 0x8e1   :  { %v4088_v7 = vpop.f32.mrb[59].mxu1 }
 0x8e2   :  { %v3162_v8 = vpop.f32.mrb[40].mxu0 }
 0x8e3   :  { %v3167_v9 = vpack.c.bf16 %v3162_v8, %v3162_v8  ;;  %v4095_v10 = vpop.f32.mrb[41].mxu0 }
 0x8e5   :  { %v3172_v11 = vsel %vm774_vm11, %v3167_v9, 0 }
 0x8e6   :  { %4097 = vmatpush3.bf16.msra.mxu0 %v3172_v11  ;;  %v3284_v12 = vpop.f32.mrb[60].mxu1 }
 0x8e7   :  { %v3289_v52 = vpack.c.bf16 %v3284_v12, %v3284_v12  ;;  %v4108_v14 = vpop.f32.mrb[61].mxu1  ;;  %v3427_v15 = vld [vmem:[#allocation2 + $0x8] sm:$0xff]  ;;  %4109 = vmatprep.subr.bf16.mxu0 %v4258_v0 }
 0x8e8   :  { %4127 = vmatmul.mubr.msk.f32.vlgmr.msra.gmra.mrb[64].mxu1 %vm253_vm8, %v3427_v15 }
 0x8e9   :  { %v3294_v17 = vsel %vm774_vm11, %v3289_v52, 0  ;;  %4099 = vmatmul.mubr.msk.bf16.vlgmr.msra.gmra.mrb[44].mxu0 %vm770_vm12, %v3642_v13 }
 0x8ea   :  { %4110 = vmatpush3.bf16.msra.mxu0 %v3294_v17  ;;  %v3421_v19 = vpop.f32.mrb[62].mxu1  ;;  %4111 = vmatprep.mubr.msk.bf16.mxu0 %vm4259_vm2, %v4258_v0 }
 0x8eb   :  { %v3422_v20 = vadd.f32 %v3649_v16, %v3421_v19  ;;  %v4121_v22 = vpop.f32.mrb[63].mxu1 }
 0x8ed   :  { %3426 = vst.msk [vmem:[%s4994_s21] sm:$0xff] %vm3425_vm13, %v3422_v20 }
 0x8f5   :  { %4112 = vmatmul.mubr.msk.bf16.vlgmr.msra.gmra.mrb[44].mxu0 %vm770_vm12, %v3647_v23 }
 0x9bb   :  { %v3508_v24 = vpop.f32.mrb[64].mxu1 }
 0x9bc   :  { %v3509_v25 = vadd.f32 %v3654_v44, %v3508_v24  ;;  %v4128_v26 = vpop.f32.mrb[65].mxu1 }
 0x9be   :  { %3512 = vst.msk [vmem:[%s4995_s22] sm:$0xff] %vm3425_vm13, %v3509_v25 }
 0x9c8   :  { %v3330_v0 = vpop.f32.mrb[44].mxu0 }
 0x9c9   :  { %v4230_v27 = vadd.f32 %v3330_v0, %v3092_v3  ;;  %v4113_v28 = vpop.f32.mrb[45].mxu0 }
 0x9ca   :  { %v3333_v29 = vpop.f32.mrb[46].mxu0 }
 0x9cb   :  { %v3337_v30 = vmax.f32 %v4230_v27, 0.0  ;;  %v4114_v31 = vpop.f32.mrb[47].mxu0 }
 0x9cd   :  { %v3338_v32 = vsel %vm75_vm10, %v3337_v30, 0.0 }
 0x9ce   :  { %3341 = vst.msk [vmem:[#allocation2 + $0x10] sm:$0xff] %vm253_vm8, %v3338_v32 }

</bundles_post_ra>
